<compile_context>
chip_gen: v6e
topology: v6e:2x2x1
jax: 0.10.0
libtpu: 0.0.40
codegen_flags: <defaults>
</compile_context>

<pallas_src>
import jax
import jax.numpy as jnp
from jax.experimental import pallas as pl
from jax.experimental.pallas import tpu as pltpu

COMPUTE_DTYPE = jnp.bfloat16   # MXU inputs + inter-layer activations
_BN_EPS = 1e-5


# ----------------------------------------------------------------------------
# Small helpers
# ----------------------------------------------------------------------------
def _silu(y):
    """SiLU on an f32 value; approx reciprocal keeps the divide on the EUP."""
    return y * pl.reciprocal(1.0 + jnp.exp(-y), approx=True)


# ----------------------------------------------------------------------------
# Host-side input repack for the stride-2 conv: pad by 1 and split into the
# four (row, col) stride-parity slabs, lane-concatenated.  Inside the kernel a
# (di, dj) tap becomes a *contiguous* slice of this block (no strided reads,
# no 9x im2col HBM traffic).
# ----------------------------------------------------------------------------
def _parity_pack(x_nhwc):
    n, h, w, c = x_nhwc.shape
    assert h % 2 == 0 and w % 2 == 0, "stride-2 parity repack assumes even H,W"
    xp = jnp.pad(x_nhwc, ((0, 0), (1, 1), (1, 1), (0, 0)))
    slabs = [xp[:, pi::2, pj::2, :] for pi in (0, 1) for pj in (0, 1)]
    return jnp.concatenate(slabs, axis=-1)          # (n, h//2+1, w//2+1, 4*c)


# ----------------------------------------------------------------------------
# The fused CspBlock kernel (one image per grid step)
# ----------------------------------------------------------------------------
def _make_csp_kernel(n_rep, ho, wo, c_in, c_hid, c2, cb):
    m = ho * wo

    def kernel(*refs):
        (xq_ref, wd_ref, bd_ref, w12_ref, b12_ref,
         w3_ref, b3_ref, w4_ref, b4_ref) = refs[:9]
        m_refs = refs[9:9 + 4 * n_rep]
        o_ref = refs[9 + 4 * n_rep]
        hpad_ref = refs[10 + 4 * n_rep]

        # ---- d: 3x3 stride-2 conv as 3 row-tap matmuls (K = 3*c_in) --------
        xq = xq_ref[...]                              # (ho+1, wo+1, 4*c_in)
        acc_d = jnp.zeros((m, c_hid), jnp.float32)
        for di in range(3):
            pi, oi = di % 2, di // 2
            rows = xq[oi:oi + ho]                     # (ho, wo+1, 4*c_in)
            even = (2 * pi) * c_in                    # column parity 0 slab
            odd = (2 * pi + 1) * c_in                 # column parity 1 slab
            op = jnp.concatenate(
                [rows[:, 0:wo, even:even + c_in],         # dj = 0
                 rows[:, 0:wo, odd:odd + c_in],           # dj = 1
                 rows[:, 1:wo + 1, even:even + c_in]],    # dj = 2
                axis=-1).reshape(m, 3 * c_in)
            acc_d = acc_d + jnp.dot(op, wd_ref[di],
                                    preferred_element_type=jnp.float32)
        xd = _silu(acc_d + bd_ref[...]).astype(COMPUTE_DTYPE)   # (m, c_hid)

        # ---- c1 / c2 fused: one lane-dense matmul, split in VMEM -----------
        y12 = jnp.dot(xd, w12_ref[...], preferred_element_type=jnp.float32)
        y12 = _silu(y12 + b12_ref[...])
        a = y12[:, :c2].astype(COMPUTE_DTYPE)         # c1 branch (bf16)
        t = y12[:, c2:]                               # c2 branch, stays f32

        # ---- bottleneck repeats (t resident in VMEM across repeats) --------
        if n_rep:
            # Zero only the halo frame of the padded scratch, once per step.
            zrow = jnp.zeros((1, wo + 2, cb), hpad_ref.dtype)
            zcol = jnp.zeros((ho + 2, 1, cb), hpad_ref.dtype)
            hpad_ref[0:1, :, :] = zrow
            hpad_ref[ho + 1:ho + 2, :, :] = zrow
            hpad_ref[:, 0:1, :] = zcol
            hpad_ref[:, wo + 1:wo + 2, :] = zcol

        for r in range(n_rep):
            w1_ref, b1_ref, w2_ref, b2_ref = m_refs[4 * r:4 * r + 4]
            h = jnp.dot(t.astype(COMPUTE_DTYPE), w1_ref[...],
                        preferred_element_type=jnp.float32)
            h = _silu(h + b1_ref[...])
            hpad_ref[1:ho + 1, 1:wo + 1, :] = (
                h.reshape(ho, wo, cb).astype(hpad_ref.dtype))
            acc = jnp.zeros((m, c2), jnp.float32)
            for di in range(3):                       # 3 row taps, K = 3*cb
                slab = hpad_ref[di:di + ho, :, :]     # (ho, wo+2, cb)
                op = jnp.concatenate(
                    [slab[:, 0:wo, :], slab[:, 1:wo + 1, :],
                     slab[:, 2:wo + 2, :]], axis=-1).reshape(m, 3 * cb)
                acc = acc + jnp.dot(op, w2_ref[di],
                                    preferred_element_type=jnp.float32)
            t = t + _silu(acc + b2_ref[...])          # residual, f32

        # ---- tail: c3 -> concat-free c4 (single K = 2*c2 contraction) ------
        b = jnp.dot(t.astype(COMPUTE_DTYPE), w3_ref[...],
                    preferred_element_type=jnp.float32)
        b = _silu(b + b3_ref[...]).astype(COMPUTE_DTYPE)
        cat = jnp.concatenate([b, a], axis=-1)        # (m, 2*c2), order [b|a]
        y = jnp.dot(cat, w4_ref[...], preferred_element_type=jnp.float32)
        y = _silu(y + b4_ref[...])
        o_ref[...] = y.reshape(ho, wo, c_hid).astype(o_ref.dtype)

    return kernel


def csp_block_forward_pallas(prep, x_nhwc):
    x = x_nhwc.astype(COMPUTE_DTYPE)
    xq = _parity_pack(x)                              # (n, ho+1, wo+1, 4*c_in)
    n, hq, wq, cq = xq.shape
    c_in = cq // 4
    ho, wo = hq - 1, wq - 1
    c_hid = prep["d_w"].shape[-1]
    c2 = prep["c3_w"].shape[0]
    n_rep = len(prep["m"])
    cb = prep["m"][0]["w1"].shape[1] if n_rep else c2

    kernel = _make_csp_kernel(n_rep, ho, wo, c_in, c_hid, c2, cb)

    args = [xq, prep["d_w"], prep["d_b"], prep["c12_w"], prep["c12_b"],
            prep["c3_w"], prep["c3_b"], prep["c4_w"], prep["c4_b"]]
    in_specs = [
        pl.BlockSpec((None, hq, wq, cq), lambda i: (i, 0, 0, 0)),
        pl.BlockSpec((3, 3 * c_in, c_hid), lambda i: (0, 0, 0)),
        pl.BlockSpec((1, c_hid), lambda i: (0, 0)),
        pl.BlockSpec((c_hid, 2 * c2), lambda i: (0, 0)),
        pl.BlockSpec((1, 2 * c2), lambda i: (0, 0)),
        pl.BlockSpec((c2, c2), lambda i: (0, 0)),
        pl.BlockSpec((1, c2), lambda i: (0, 0)),
        pl.BlockSpec((2 * c2, c_hid), lambda i: (0, 0)),
        pl.BlockSpec((1, c_hid), lambda i: (0, 0)),
    ]
    for blk in prep["m"]:
        args += [blk["w1"], blk["b1"], blk["w2"], blk["b2"]]
        in_specs += [
            pl.BlockSpec((c2, cb), lambda i: (0, 0)),
            pl.BlockSpec((1, cb), lambda i: (0, 0)),
            pl.BlockSpec((3, 3 * cb, c2), lambda i: (0, 0, 0)),
            pl.BlockSpec((1, c2), lambda i: (0, 0)),
        ]

    # Explicit scoped-VMEM request sized from the per-step working set,
    # clamped under v7x's 64 MiB physical VMEM (v5e/v6e have 128 MiB).
    bpe = jnp.dtype(COMPUTE_DTYPE).itemsize
    block_bytes = 2 * (hq * wq * cq + ho * wo * c_hid) * bpe   # dbl-buffered I/O
    weight_bytes = sum(int(a.size) * a.dtype.itemsize for a in args[1:])
    scratch_bytes = (ho + 2) * (wo + 2) * cb * bpe
    live_f32 = ho * wo * (c_hid + 3 * c2 + 3 * max(cb, c_in)) * 4
    vmem_limit = int(min(max(2 * (block_bytes + weight_bytes + scratch_bytes
                                  + live_f32), 32 << 20), 56 << 20))

    out = pl.pallas_call(
        kernel,
        out_shape=jax.ShapeDtypeStruct((n, ho, wo, c_hid), COMPUTE_DTYPE),
        grid=(n,),
        in_specs=in_specs,
        out_specs=pl.BlockSpec((None, ho, wo, c_hid), lambda i: (i, 0, 0, 0)),
        scratch_shapes=[pltpu.VMEM((ho + 2, wo + 2, cb), COMPUTE_DTYPE)],
        compiler_params=pltpu.CompilerParams(
            dimension_semantics=("parallel",),
            vmem_limit_bytes=vmem_limit),
    )(*args)
    return out


# ----------------------------------------------------------------------------
# Parameter construction (raw, f32) and Pallas-side preparation (folded, bf16)
# ----------------------------------------------------------------------------
def make_conv_bn(key, cin, cout, k):
    kw, kg, kb, km, kv = jax.random.split(key, 5)
    w = jax.random.normal(kw, (cout, cin, k, k), jnp.float32) * 0.1
    gamma = 1.0 + 0.1 * jax.random.normal(kg, (cout,), jnp.float32)
    beta = 0.05 * jax.random.normal(kb, (cout,), jnp.float32)
    mean = 0.05 * jax.random.normal(km, (cout,), jnp.float32)
    var = 1.0 + 0.1 * jax.random.uniform(kv, (cout,), jnp.float32)
    scale = gamma / jnp.sqrt(var + _BN_EPS)
    bias = beta - mean * scale
    return {"w": w, "scale": scale, "bias": bias}


def make_csp_params(key, c1, c2, f=1, e=1, n=1):
    c_ = int(c2 * f)
    cb = int(c2 * e)
    keys = jax.random.split(key, 5 + 2 * n)
    return {
        "d": make_conv_bn(keys[0], c1, c_, 3),
        "c1": make_conv_bn(keys[1], c_, c2, 1),
        "c2": make_conv_bn(keys[2], c_, c2, 1),
        "c3": make_conv_bn(keys[3], c2, c2, 1),
        "c4": make_conv_bn(keys[4], 2 * c2, c_, 1),
        "m": [{"b1": make_conv_bn(keys[5 + 2 * i], c2, cb, 1),
               "b2": make_conv_bn(keys[6 + 2 * i], cb, c2, 3)}
              for i in range(n)],
    }


def _fold1x1(cp):
    """(Cout,Cin,1,1) torch weight -> (Cin, Cout) with BN scale folded in."""
    w, scale = cp["w"], cp["scale"]
    cout = w.shape[0]
    wm = jnp.transpose(w, (2, 3, 1, 0)).reshape(-1, cout)
    return (wm * scale[None, :]).astype(COMPUTE_DTYPE)


def _fold3x3(cp):
    """(Cout,Cin,3,3) torch weight -> (3, 3*Cin, Cout): one row-tap slab per
    kernel row (kh), columns ordered (kw, Cin) to match the in-kernel lane
    concatenation of the dj=0,1,2 patches."""
    w, scale = cp["w"], cp["scale"]
    cout, cin = w.shape[0], w.shape[1]
    wm = jnp.transpose(w, (2, 3, 1, 0)).reshape(3, 3 * cin, cout)
    return (wm * scale[None, None, :]).astype(COMPUTE_DTYPE)


def _bias2d(cp):
    return cp["bias"].reshape(1, -1).astype(jnp.float32)


def prepare_csp_params(p):
    return {
        "d_w": _fold3x3(p["d"]), "d_b": _bias2d(p["d"]),
        "c12_w": jnp.concatenate([_fold1x1(p["c1"]), _fold1x1(p["c2"])], axis=1),
        "c12_b": jnp.concatenate([p["c1"]["bias"], p["c2"]["bias"]]
                                 ).reshape(1, -1).astype(jnp.float32),
        "c3_w": _fold1x1(p["c3"]), "c3_b": _bias2d(p["c3"]),
        "c4_w": _fold1x1(p["c4"]), "c4_b": _bias2d(p["c4"]),
        "m": [{"w1": _fold1x1(blk["b1"]), "b1": _bias2d(blk["b1"]),
               "w2": _fold3x3(blk["b2"]), "b2": _bias2d(blk["b2"])}
              for blk in p["m"]],
    }


# ----------------------------------------------------------------------------
# Pure-JAX f32 reference (same eval-mode BN semantics)
# ----------------------------------------------------------------------------
def ref_conv_bn_silu(x, cp, k, s=1):
    p = k // 2
    y = jax.lax.conv_general_dilated(
        x, jnp.transpose(cp["w"], (2, 3, 1, 0)),
        window_strides=(s, s), padding=[(p, p), (p, p)],
        dimension_numbers=("NHWC", "HWIO", "NHWC"))
    y = y * cp["scale"] + cp["bias"]
    return y * jax.nn.sigmoid(y)


def csp_block_forward_ref(params, x):
    p = params
    xd = ref_conv_bn_silu(x, p["d"], k=3, s=2)
    a = ref_conv_bn_silu(xd, p["c1"], k=1)
    t = ref_conv_bn_silu(xd, p["c2"], k=1)
    for blk in p["m"]:
        h = ref_conv_bn_silu(t, blk["b1"], k=1)
        t = t + ref_conv_bn_silu(h, blk["b2"], k=3)
    b = ref_conv_bn_silu(t, p["c3"], k=1)
    cat = jnp.concatenate([b, a], axis=-1)     # torch.cat([b, a], dim=1)
    return ref_conv_bn_silu(cat, p["c4"], k=1)


# ----------------------------------------------------------------------------
if __name__ == "__main__":
    key = jax.random.PRNGKey(0)

    configs = [
        # (c1, c2, f,   e,  n_rep, B, H,  W)
        (4, 8, 1, 1.0, 1, 2, 16, 16),    # test-sized CspBlock(4, 8, 1, 1, 1)
        (8, 8, 2, 0.5, 2, 2, 16, 16),    # wider hidden, e=0.5, 2 repeats
    ]

    for cfg_i, (C1, C2, F, E, N_REP, B, H, W) in enumerate(configs):
        key, k_in, k_par = jax.random.split(key, 3)
        x_nchw = jax.random.normal(k_in, (B, C1, H, W), jnp.float32)
        x_nhwc = jnp.transpose(x_nchw, (0, 2, 3, 1))

        params = make_csp_params(k_par, C1, C2, f=F, e=E, n=N_REP)
        prep = prepare_csp_params(params)

        fwd = jax.jit(csp_block_forward_pallas)
        out = jax.block_until_ready(fwd(prep, x_nhwc))
        ref = jax.block_until_ready(csp_block_forward_ref(params, x_nhwc))

        assert out.shape == (B, H // 2, W // 2, int(C2 * F)), (cfg_i, out.shape)
        out_f32 = out.astype(jnp.float32)
        assert bool(jnp.all(jnp.isfinite(out_f32))), cfg_i
        max_ref = float(jnp.max(jnp.abs(ref)))
        max_err = float(jnp.max(jnp.abs(out_f32 - ref)))
        tol = 5e-2 * max(1.0, max_ref)   # bf16 MXU inputs / activations
        assert max_err < tol, f"cfg {cfg_i}: mismatch {max_err} (tol {tol})"

    print("KERNEL_OK")
</pallas_src>

<mosaic_0001>
module attributes {stable_mosaic.version = 11 : i64} {
  func.func @kernel(%arg0: i32, %arg1: memref<1x9x9x16xbf16, #tpu.memory_space<vmem>>, %arg2: memref<3x12x8xbf16, #tpu.memory_space<vmem>>, %arg3: memref<1x8xf32, #tpu.memory_space<vmem>>, %arg4: memref<8x16xbf16, #tpu.memory_space<vmem>>, %arg5: memref<1x16xf32, #tpu.memory_space<vmem>>, %arg6: memref<8x8xbf16, #tpu.memory_space<vmem>>, %arg7: memref<1x8xf32, #tpu.memory_space<vmem>>, %arg8: memref<16x8xbf16, #tpu.memory_space<vmem>>, %arg9: memref<1x8xf32, #tpu.memory_space<vmem>>, %arg10: memref<8x8xbf16, #tpu.memory_space<vmem>>, %arg11: memref<1x8xf32, #tpu.memory_space<vmem>>, %arg12: memref<3x24x8xbf16, #tpu.memory_space<vmem>>, %arg13: memref<1x8xf32, #tpu.memory_space<vmem>>, %arg14: memref<1x8x8x8xbf16, #tpu.memory_space<vmem>>, %arg15: memref<10x10x8xbf16, #tpu.memory_space<vmem>>) attributes {dimension_semantics = [#tpu.dimension_semantics<parallel>], iteration_bounds = array<i64: 2>, scalar_prefetch = 0 : i64, scratch_operands = 1 : i64, tpu.core_type = #tpu.core_type<tc>, window_params = [{transform_indices = @transform_0, window_bounds = array<i64: 1, 9, 9, 16>}, {pipeline_mode = #tpu.pipeline_mode<synchronous>, transform_indices = @transform_1, window_bounds = array<i64: 3, 12, 8>}, {pipeline_mode = #tpu.pipeline_mode<synchronous>, transform_indices = @transform_2, window_bounds = array<i64: 1, 8>}, {pipeline_mode = #tpu.pipeline_mode<synchronous>, transform_indices = @transform_3, window_bounds = array<i64: 8, 16>}, {pipeline_mode = #tpu.pipeline_mode<synchronous>, transform_indices = @transform_4, window_bounds = array<i64: 1, 16>}, {pipeline_mode = #tpu.pipeline_mode<synchronous>, transform_indices = @transform_5, window_bounds = array<i64: 8, 8>}, {pipeline_mode = #tpu.pipeline_mode<synchronous>, transform_indices = @transform_6, window_bounds = array<i64: 1, 8>}, {pipeline_mode = #tpu.pipeline_mode<synchronous>, transform_indices = @transform_7, window_bounds = array<i64: 16, 8>}, {pipeline_mode = #tpu.pipeline_mode<synchronous>, transform_indices = @transform_8, window_bounds = array<i64: 1, 8>}, {pipeline_mode = #tpu.pipeline_mode<synchronous>, transform_indices = @transform_9, window_bounds = array<i64: 8, 8>}, {pipeline_mode = #tpu.pipeline_mode<synchronous>, transform_indices = @transform_10, window_bounds = array<i64: 1, 8>}, {pipeline_mode = #tpu.pipeline_mode<synchronous>, transform_indices = @transform_11, window_bounds = array<i64: 3, 24, 8>}, {pipeline_mode = #tpu.pipeline_mode<synchronous>, transform_indices = @transform_12, window_bounds = array<i64: 1, 8>}, {transform_indices = @transform_13, window_bounds = array<i64: 1, 8, 8, 8>}]} {
    %c0 = arith.constant 0 : index
    %c0_0 = arith.constant 0 : index
    %c0_1 = arith.constant 0 : index
    %c0_2 = arith.constant 0 : index
    %0 = vector.load %arg1[%c0, %c0_0, %c0_1, %c0_2] : memref<1x9x9x16xbf16, #tpu.memory_space<vmem>>, vector<1x9x9x16xbf16>
    %1 = vector.shape_cast %0 : vector<1x9x9x16xbf16> to vector<9x9x16xbf16>
    %cst = arith.constant 0.000000e+00 : f32
    %2 = vector.broadcast %cst : f32 to vector<64x8xf32>
    %3 = vector.extract_strided_slice %1 {offsets = [0, 0, 0], sizes = [8, 9, 16], strides = [1, 1, 1]} : vector<9x9x16xbf16> to vector<8x9x16xbf16>
    %4 = vector.extract_strided_slice %3 {offsets = [0, 0, 0], sizes = [8, 8, 4], strides = [1, 1, 1]} : vector<8x9x16xbf16> to vector<8x8x4xbf16>
    %5 = vector.extract_strided_slice %3 {offsets = [0, 0, 4], sizes = [8, 8, 4], strides = [1, 1, 1]} : vector<8x9x16xbf16> to vector<8x8x4xbf16>
    %6 = vector.extract_strided_slice %3 {offsets = [0, 1, 0], sizes = [8, 8, 4], strides = [1, 1, 1]} : vector<8x9x16xbf16> to vector<8x8x4xbf16>
    %7 = tpu.concatenate %4, %5, %6 in 2 : vector<8x8x4xbf16>, vector<8x8x4xbf16>, vector<8x8x4xbf16> -> vector<8x8x12xbf16>
    %8 = vector.shape_cast %7 : vector<8x8x12xbf16> to vector<64x12xbf16>
    %c0_3 = arith.constant 0 : index
    %c0_4 = arith.constant 0 : index
    %c0_5 = arith.constant 0 : index
    %9 = vector.load %arg2[%c0_3, %c0_4, %c0_5] : memref<3x12x8xbf16, #tpu.memory_space<vmem>>, vector<1x12x8xbf16>
    %10 = vector.shape_cast %9 : vector<1x12x8xbf16> to vector<12x8xbf16>
    %cst_6 = arith.constant dense<0.000000e+00> : vector<64x8xf32>
    %11 = tpu.matmul %8, %10, %cst_6 {dimension_numbers = #tpu.dot_dimension_numbers<[1], [0], [0], [1], [0, 0, 1, 1], [], []>} : vector<64x12xbf16>, vector<12x8xbf16>, vector<64x8xf32> -> vector<64x8xf32>
    %12 = arith.addf %2, %11 : vector<64x8xf32>
    %13 = vector.extract_strided_slice %1 {offsets = [0, 0, 0], sizes = [8, 9, 16], strides = [1, 1, 1]} : vector<9x9x16xbf16> to vector<8x9x16xbf16>
    %14 = vector.extract_strided_slice %13 {offsets = [0, 0, 8], sizes = [8, 8, 4], strides = [1, 1, 1]} : vector<8x9x16xbf16> to vector<8x8x4xbf16>
    %15 = vector.extract_strided_slice %13 {offsets = [0, 0, 12], sizes = [8, 8, 4], strides = [1, 1, 1]} : vector<8x9x16xbf16> to vector<8x8x4xbf16>
    %16 = vector.extract_strided_slice %13 {offsets = [0, 1, 8], sizes = [8, 8, 4], strides = [1, 1, 1]} : vector<8x9x16xbf16> to vector<8x8x4xbf16>
    %17 = tpu.concatenate %14, %15, %16 in 2 : vector<8x8x4xbf16>, vector<8x8x4xbf16>, vector<8x8x4xbf16> -> vector<8x8x12xbf16>
    %18 = vector.shape_cast %17 : vector<8x8x12xbf16> to vector<64x12xbf16>
    %c1 = arith.constant 1 : index
    %c0_7 = arith.constant 0 : index
    %c0_8 = arith.constant 0 : index
    %19 = vector.load %arg2[%c1, %c0_7, %c0_8] : memref<3x12x8xbf16, #tpu.memory_space<vmem>>, vector<1x12x8xbf16>
    %20 = vector.shape_cast %19 : vector<1x12x8xbf16> to vector<12x8xbf16>
    %cst_9 = arith.constant dense<0.000000e+00> : vector<64x8xf32>
    %21 = tpu.matmul %18, %20, %cst_9 {dimension_numbers = #tpu.dot_dimension_numbers<[1], [0], [0], [1], [0, 0, 1, 1], [], []>} : vector<64x12xbf16>, vector<12x8xbf16>, vector<64x8xf32> -> vector<64x8xf32>
    %22 = arith.addf %12, %21 : vector<64x8xf32>
    %23 = vector.extract_strided_slice %1 {offsets = [1, 0, 0], sizes = [8, 9, 16], strides = [1, 1, 1]} : vector<9x9x16xbf16> to vector<8x9x16xbf16>
    %24 = vector.extract_strided_slice %23 {offsets = [0, 0, 0], sizes = [8, 8, 4], strides = [1, 1, 1]} : vector<8x9x16xbf16> to vector<8x8x4xbf16>
    %25 = vector.extract_strided_slice %23 {offsets = [0, 0, 4], sizes = [8, 8, 4], strides = [1, 1, 1]} : vector<8x9x16xbf16> to vector<8x8x4xbf16>
    %26 = vector.extract_strided_slice %23 {offsets = [0, 1, 0], sizes = [8, 8, 4], strides = [1, 1, 1]} : vector<8x9x16xbf16> to vector<8x8x4xbf16>
    %27 = tpu.concatenate %24, %25, %26 in 2 : vector<8x8x4xbf16>, vector<8x8x4xbf16>, vector<8x8x4xbf16> -> vector<8x8x12xbf16>
    %28 = vector.shape_cast %27 : vector<8x8x12xbf16> to vector<64x12xbf16>
    %c2 = arith.constant 2 : index
    %c0_10 = arith.constant 0 : index
    %c0_11 = arith.constant 0 : index
    %29 = vector.load %arg2[%c2, %c0_10, %c0_11] : memref<3x12x8xbf16, #tpu.memory_space<vmem>>, vector<1x12x8xbf16>
    %30 = vector.shape_cast %29 : vector<1x12x8xbf16> to vector<12x8xbf16>
    %cst_12 = arith.constant dense<0.000000e+00> : vector<64x8xf32>
    %31 = tpu.matmul %28, %30, %cst_12 {dimension_numbers = #tpu.dot_dimension_numbers<[1], [0], [0], [1], [0, 0, 1, 1], [], []>} : vector<64x12xbf16>, vector<12x8xbf16>, vector<64x8xf32> -> vector<64x8xf32>
    %32 = arith.addf %22, %31 : vector<64x8xf32>
    %c0_13 = arith.constant 0 : index
    %c0_14 = arith.constant 0 : index
    %33 = vector.load %arg3[%c0_13, %c0_14] : memref<1x8xf32, #tpu.memory_space<vmem>>, vector<1x8xf32>
    %34 = vector.broadcast %33 : vector<1x8xf32> to vector<64x8xf32>
    %35 = arith.addf %32, %34 : vector<64x8xf32>
    %cst_15 = arith.constant 0.000000e+00 : f32
    %36 = vector.broadcast %cst_15 : f32 to vector<64x8xf32>
    %37 = arith.subf %36, %35 : vector<64x8xf32>
    %38 = math.exp %37 : vector<64x8xf32>
    %cst_16 = arith.constant 1.000000e+00 : f32
    %39 = vector.broadcast %cst_16 : f32 to vector<64x8xf32>
    %40 = arith.addf %39, %38 : vector<64x8xf32>
    %41 = tpu.reciprocal %40 {approx = true} : vector<64x8xf32> -> vector<64x8xf32>
    %42 = arith.mulf %35, %41 : vector<64x8xf32>
    %43 = arith.truncf %42 : vector<64x8xf32> to vector<64x8xbf16>
    %c0_17 = arith.constant 0 : index
    %c0_18 = arith.constant 0 : index
    %44 = vector.load %arg4[%c0_17, %c0_18] : memref<8x16xbf16, #tpu.memory_space<vmem>>, vector<8x16xbf16>
    %cst_19 = arith.constant dense<0.000000e+00> : vector<64x16xf32>
    %45 = tpu.matmul %43, %44, %cst_19 {dimension_numbers = #tpu.dot_dimension_numbers<[1], [0], [0], [1], [0, 0, 1, 1], [], []>} : vector<64x8xbf16>, vector<8x16xbf16>, vector<64x16xf32> -> vector<64x16xf32>
    %c0_20 = arith.constant 0 : index
    %c0_21 = arith.constant 0 : index
    %46 = vector.load %arg5[%c0_20, %c0_21] : memref<1x16xf32, #tpu.memory_space<vmem>>, vector<1x16xf32>
    %47 = vector.broadcast %46 : vector<1x16xf32> to vector<64x16xf32>
    %48 = arith.addf %45, %47 : vector<64x16xf32>
    %cst_22 = arith.constant 0.000000e+00 : f32
    %49 = vector.broadcast %cst_22 : f32 to vector<64x16xf32>
    %50 = arith.subf %49, %48 : vector<64x16xf32>
    %51 = math.exp %50 : vector<64x16xf32>
    %cst_23 = arith.constant 1.000000e+00 : f32
    %52 = vector.broadcast %cst_23 : f32 to vector<64x16xf32>
    %53 = arith.addf %52, %51 : vector<64x16xf32>
    %54 = tpu.reciprocal %53 {approx = true} : vector<64x16xf32> -> vector<64x16xf32>
    %55 = arith.mulf %48, %54 : vector<64x16xf32>
    %56 = vector.extract_strided_slice %55 {offsets = [0, 0], sizes = [64, 8], strides = [1, 1]} : vector<64x16xf32> to vector<64x8xf32>
    %57 = arith.truncf %56 : vector<64x8xf32> to vector<64x8xbf16>
    %58 = vector.extract_strided_slice %55 {offsets = [0, 8], sizes = [64, 8], strides = [1, 1]} : vector<64x16xf32> to vector<64x8xf32>
    %cst_24 = arith.constant 0.000000e+00 : bf16
    %59 = vector.broadcast %cst_24 : bf16 to vector<1x10x8xbf16>
    %cst_25 = arith.constant 0.000000e+00 : bf16
    %60 = vector.broadcast %cst_25 : bf16 to vector<10x1x8xbf16>
    %c0_26 = arith.constant 0 : index
    %c0_27 = arith.constant 0 : index
    %c0_28 = arith.constant 0 : index
    %61 = vector.load %arg15[%c0_26, %c0_27, %c0_28] : memref<10x10x8xbf16, #tpu.memory_space<vmem>>, vector<1x10x8xbf16>
    tpu.vector_store %arg15[%c0_26, %c0_27, %c0_28], %59 {strides = array<i32>} : memref<10x10x8xbf16, #tpu.memory_space<vmem>>, vector<1x10x8xbf16>,
    %c9 = arith.constant 9 : index
    %c0_29 = arith.constant 0 : index
    %c0_30 = arith.constant 0 : index
    %62 = vector.load %arg15[%c9, %c0_29, %c0_30] : memref<10x10x8xbf16, #tpu.memory_space<vmem>>, vector<1x10x8xbf16>
    tpu.vector_store %arg15[%c9, %c0_29, %c0_30], %59 {strides = array<i32>} : memref<10x10x8xbf16, #tpu.memory_space<vmem>>, vector<1x10x8xbf16>,
    %c0_31 = arith.constant 0 : index
    %c0_32 = arith.constant 0 : index
    %c0_33 = arith.constant 0 : index
    %63 = vector.load %arg15[%c0_31, %c0_32, %c0_33] : memref<10x10x8xbf16, #tpu.memory_space<vmem>>, vector<10x1x8xbf16>
    tpu.vector_store %arg15[%c0_31, %c0_32, %c0_33], %60 {strides = array<i32>} : memref<10x10x8xbf16, #tpu.memory_space<vmem>>, vector<10x1x8xbf16>,
    %c0_34 = arith.constant 0 : index
    %c9_35 = arith.constant 9 : index
    %c0_36 = arith.constant 0 : index
    %64 = vector.load %arg15[%c0_34, %c9_35, %c0_36] : memref<10x10x8xbf16, #tpu.memory_space<vmem>>, vector<10x1x8xbf16>
    tpu.vector_store %arg15[%c0_34, %c9_35, %c0_36], %60 {strides = array<i32>} : memref<10x10x8xbf16, #tpu.memory_space<vmem>>, vector<10x1x8xbf16>,
    %65 = arith.truncf %58 : vector<64x8xf32> to vector<64x8xbf16>
    %c0_37 = arith.constant 0 : index
    %c0_38 = arith.constant 0 : index
    %66 = vector.load %arg10[%c0_37, %c0_38] : memref<8x8xbf16, #tpu.memory_space<vmem>>, vector<8x8xbf16>
    %cst_39 = arith.constant dense<0.000000e+00> : vector<64x8xf32>
    %67 = tpu.matmul %65, %66, %cst_39 {dimension_numbers = #tpu.dot_dimension_numbers<[1], [0], [0], [1], [0, 0, 1, 1], [], []>} : vector<64x8xbf16>, vector<8x8xbf16>, vector<64x8xf32> -> vector<64x8xf32>
    %c0_40 = arith.constant 0 : index
    %c0_41 = arith.constant 0 : index
    %68 = vector.load %arg11[%c0_40, %c0_41] : memref<1x8xf32, #tpu.memory_space<vmem>>, vector<1x8xf32>
    %69 = vector.broadcast %68 : vector<1x8xf32> to vector<64x8xf32>
    %70 = arith.addf %67, %69 : vector<64x8xf32>
    %cst_42 = arith.constant 0.000000e+00 : f32
    %71 = vector.broadcast %cst_42 : f32 to vector<64x8xf32>
    %72 = arith.subf %71, %70 : vector<64x8xf32>
    %73 = math.exp %72 : vector<64x8xf32>
    %cst_43 = arith.constant 1.000000e+00 : f32
    %74 = vector.broadcast %cst_43 : f32 to vector<64x8xf32>
    %75 = arith.addf %74, %73 : vector<64x8xf32>
    %76 = tpu.reciprocal %75 {approx = true} : vector<64x8xf32> -> vector<64x8xf32>
    %77 = arith.mulf %70, %76 : vector<64x8xf32>
    %78 = vector.shape_cast %77 : vector<64x8xf32> to vector<8x8x8xf32>
    %79 = arith.truncf %78 : vector<8x8x8xf32> to vector<8x8x8xbf16>
    %c1_44 = arith.constant 1 : index
    %c1_45 = arith.constant 1 : index
    %c0_46 = arith.constant 0 : index
    %80 = vector.load %arg15[%c1_44, %c1_45, %c0_46] : memref<10x10x8xbf16, #tpu.memory_space<vmem>>, vector<8x8x8xbf16>
    tpu.vector_store %arg15[%c1_44, %c1_45, %c0_46], %79 {strides = array<i32>} : memref<10x10x8xbf16, #tpu.memory_space<vmem>>, vector<8x8x8xbf16>,
    %cst_47 = arith.constant 0.000000e+00 : f32
    %81 = vector.broadcast %cst_47 : f32 to vector<64x8xf32>
    %c0_48 = arith.constant 0 : index
    %c0_49 = arith.constant 0 : index
    %c0_50 = arith.constant 0 : index
    %82 = vector.load %arg15[%c0_48, %c0_49, %c0_50] : memref<10x10x8xbf16, #tpu.memory_space<vmem>>, vector<8x10x8xbf16>
    %83 = vector.extract_strided_slice %82 {offsets = [0, 0, 0], sizes = [8, 8, 8], strides = [1, 1, 1]} : vector<8x10x8xbf16> to vector<8x8x8xbf16>
    %84 = vector.extract_strided_slice %82 {offsets = [0, 1, 0], sizes = [8, 8, 8], strides = [1, 1, 1]} : vector<8x10x8xbf16> to vector<8x8x8xbf16>
    %85 = vector.extract_strided_slice %82 {offsets = [0, 2, 0], sizes = [8, 8, 8], strides = [1, 1, 1]} : vector<8x10x8xbf16> to vector<8x8x8xbf16>
    %86 = tpu.concatenate %83, %84, %85 in 2 : vector<8x8x8xbf16>, vector<8x8x8xbf16>, vector<8x8x8xbf16> -> vector<8x8x24xbf16>
    %87 = vector.shape_cast %86 : vector<8x8x24xbf16> to vector<64x24xbf16>
    %c0_51 = arith.constant 0 : index
    %c0_52 = arith.constant 0 : index
    %c0_53 = arith.constant 0 : index
    %88 = vector.load %arg12[%c0_51, %c0_52, %c0_53] : memref<3x24x8xbf16, #tpu.memory_space<vmem>>, vector<1x24x8xbf16>
    %89 = vector.shape_cast %88 : vector<1x24x8xbf16> to vector<24x8xbf16>
    %cst_54 = arith.constant dense<0.000000e+00> : vector<64x8xf32>
    %90 = tpu.matmul %87, %89, %cst_54 {dimension_numbers = #tpu.dot_dimension_numbers<[1], [0], [0], [1], [0, 0, 1, 1], [], []>} : vector<64x24xbf16>, vector<24x8xbf16>, vector<64x8xf32> -> vector<64x8xf32>
    %91 = arith.addf %81, %90 : vector<64x8xf32>
    %c1_55 = arith.constant 1 : index
    %c0_56 = arith.constant 0 : index
    %c0_57 = arith.constant 0 : index
    %92 = vector.load %arg15[%c1_55, %c0_56, %c0_57] : memref<10x10x8xbf16, #tpu.memory_space<vmem>>, vector<8x10x8xbf16>
    %93 = vector.extract_strided_slice %92 {offsets = [0, 0, 0], sizes = [8, 8, 8], strides = [1, 1, 1]} : vector<8x10x8xbf16> to vector<8x8x8xbf16>
    %94 = vector.extract_strided_slice %92 {offsets = [0, 1, 0], sizes = [8, 8, 8], strides = [1, 1, 1]} : vector<8x10x8xbf16> to vector<8x8x8xbf16>
    %95 = vector.extract_strided_slice %92 {offsets = [0, 2, 0], sizes = [8, 8, 8], strides = [1, 1, 1]} : vector<8x10x8xbf16> to vector<8x8x8xbf16>
    %96 = tpu.concatenate %93, %94, %95 in 2 : vector<8x8x8xbf16>, vector<8x8x8xbf16>, vector<8x8x8xbf16> -> vector<8x8x24xbf16>
    %97 = vector.shape_cast %96 : vector<8x8x24xbf16> to vector<64x24xbf16>
    %c1_58 = arith.constant 1 : index
    %c0_59 = arith.constant 0 : index
    %c0_60 = arith.constant 0 : index
    %98 = vector.load %arg12[%c1_58, %c0_59, %c0_60] : memref<3x24x8xbf16, #tpu.memory_space<vmem>>, vector<1x24x8xbf16>
    %99 = vector.shape_cast %98 : vector<1x24x8xbf16> to vector<24x8xbf16>
    %cst_61 = arith.constant dense<0.000000e+00> : vector<64x8xf32>
    %100 = tpu.matmul %97, %99, %cst_61 {dimension_numbers = #tpu.dot_dimension_numbers<[1], [0], [0], [1], [0, 0, 1, 1], [], []>} : vector<64x24xbf16>, vector<24x8xbf16>, vector<64x8xf32> -> vector<64x8xf32>
    %101 = arith.addf %91, %100 : vector<64x8xf32>
    %c2_62 = arith.constant 2 : index
    %c0_63 = arith.constant 0 : index
    %c0_64 = arith.constant 0 : index
    %102 = vector.load %arg15[%c2_62, %c0_63, %c0_64] : memref<10x10x8xbf16, #tpu.memory_space<vmem>>, vector<8x10x8xbf16>
    %103 = vector.extract_strided_slice %102 {offsets = [0, 0, 0], sizes = [8, 8, 8], strides = [1, 1, 1]} : vector<8x10x8xbf16> to vector<8x8x8xbf16>
    %104 = vector.extract_strided_slice %102 {offsets = [0, 1, 0], sizes = [8, 8, 8], strides = [1, 1, 1]} : vector<8x10x8xbf16> to vector<8x8x8xbf16>
    %105 = vector.extract_strided_slice %102 {offsets = [0, 2, 0], sizes = [8, 8, 8], strides = [1, 1, 1]} : vector<8x10x8xbf16> to vector<8x8x8xbf16>
    %106 = tpu.concatenate %103, %104, %105 in 2 : vector<8x8x8xbf16>, vector<8x8x8xbf16>, vector<8x8x8xbf16> -> vector<8x8x24xbf16>
    %107 = vector.shape_cast %106 : vector<8x8x24xbf16> to vector<64x24xbf16>
    %c2_65 = arith.constant 2 : index
    %c0_66 = arith.constant 0 : index
    %c0_67 = arith.constant 0 : index
    %108 = vector.load %arg12[%c2_65, %c0_66, %c0_67] : memref<3x24x8xbf16, #tpu.memory_space<vmem>>, vector<1x24x8xbf16>
    %109 = vector.shape_cast %108 : vector<1x24x8xbf16> to vector<24x8xbf16>
    %cst_68 = arith.constant dense<0.000000e+00> : vector<64x8xf32>
    %110 = tpu.matmul %107, %109, %cst_68 {dimension_numbers = #tpu.dot_dimension_numbers<[1], [0], [0], [1], [0, 0, 1, 1], [], []>} : vector<64x24xbf16>, vector<24x8xbf16>, vector<64x8xf32> -> vector<64x8xf32>
    %111 = arith.addf %101, %110 : vector<64x8xf32>
    %c0_69 = arith.constant 0 : index
    %c0_70 = arith.constant 0 : index
    %112 = vector.load %arg13[%c0_69, %c0_70] : memref<1x8xf32, #tpu.memory_space<vmem>>, vector<1x8xf32>
    %113 = vector.broadcast %112 : vector<1x8xf32> to vector<64x8xf32>
    %114 = arith.addf %111, %113 : vector<64x8xf32>
    %cst_71 = arith.constant 0.000000e+00 : f32
    %115 = vector.broadcast %cst_71 : f32 to vector<64x8xf32>
    %116 = arith.subf %115, %114 : vector<64x8xf32>
    %117 = math.exp %116 : vector<64x8xf32>
    %cst_72 = arith.constant 1.000000e+00 : f32
    %118 = vector.broadcast %cst_72 : f32 to vector<64x8xf32>
    %119 = arith.addf %118, %117 : vector<64x8xf32>
    %120 = tpu.reciprocal %119 {approx = true} : vector<64x8xf32> -> vector<64x8xf32>
    %121 = arith.mulf %114, %120 : vector<64x8xf32>
    %122 = arith.addf %58, %121 : vector<64x8xf32>
    %123 = arith.truncf %122 : vector<64x8xf32> to vector<64x8xbf16>
    %c0_73 = arith.constant 0 : index
    %c0_74 = arith.constant 0 : index
    %124 = vector.load %arg6[%c0_73, %c0_74] : memref<8x8xbf16, #tpu.memory_space<vmem>>, vector<8x8xbf16>
    %cst_75 = arith.constant dense<0.000000e+00> : vector<64x8xf32>
    %125 = tpu.matmul %123, %124, %cst_75 {dimension_numbers = #tpu.dot_dimension_numbers<[1], [0], [0], [1], [0, 0, 1, 1], [], []>} : vector<64x8xbf16>, vector<8x8xbf16>, vector<64x8xf32> -> vector<64x8xf32>
    %c0_76 = arith.constant 0 : index
    %c0_77 = arith.constant 0 : index
    %126 = vector.load %arg7[%c0_76, %c0_77] : memref<1x8xf32, #tpu.memory_space<vmem>>, vector<1x8xf32>
    %127 = vector.broadcast %126 : vector<1x8xf32> to vector<64x8xf32>
    %128 = arith.addf %125, %127 : vector<64x8xf32>
    %cst_78 = arith.constant 0.000000e+00 : f32
    %129 = vector.broadcast %cst_78 : f32 to vector<64x8xf32>
    %130 = arith.subf %129, %128 : vector<64x8xf32>
    %131 = math.exp %130 : vector<64x8xf32>
    %cst_79 = arith.constant 1.000000e+00 : f32
    %132 = vector.broadcast %cst_79 : f32 to vector<64x8xf32>
    %133 = arith.addf %132, %131 : vector<64x8xf32>
    %134 = tpu.reciprocal %133 {approx = true} : vector<64x8xf32> -> vector<64x8xf32>
    %135 = arith.mulf %128, %134 : vector<64x8xf32>
    %136 = arith.truncf %135 : vector<64x8xf32> to vector<64x8xbf16>
    %137 = tpu.concatenate %136, %57 in 1 : vector<64x8xbf16>, vector<64x8xbf16> -> vector<64x16xbf16>
    %c0_80 = arith.constant 0 : index
    %c0_81 = arith.constant 0 : index
    %138 = vector.load %arg8[%c0_80, %c0_81] : memref<16x8xbf16, #tpu.memory_space<vmem>>, vector<16x8xbf16>
    %cst_82 = arith.constant dense<0.000000e+00> : vector<64x8xf32>
    %139 = tpu.matmul %137, %138, %cst_82 {dimension_numbers = #tpu.dot_dimension_numbers<[1], [0], [0], [1], [0, 0, 1, 1], [], []>} : vector<64x16xbf16>, vector<16x8xbf16>, vector<64x8xf32> -> vector<64x8xf32>
    %c0_83 = arith.constant 0 : index
    %c0_84 = arith.constant 0 : index
    %140 = vector.load %arg9[%c0_83, %c0_84] : memref<1x8xf32, #tpu.memory_space<vmem>>, vector<1x8xf32>
    %141 = vector.broadcast %140 : vector<1x8xf32> to vector<64x8xf32>
    %142 = arith.addf %139, %141 : vector<64x8xf32>
    %cst_85 = arith.constant 0.000000e+00 : f32
    %143 = vector.broadcast %cst_85 : f32 to vector<64x8xf32>
    %144 = arith.subf %143, %142 : vector<64x8xf32>
    %145 = math.exp %144 : vector<64x8xf32>
    %cst_86 = arith.constant 1.000000e+00 : f32
    %146 = vector.broadcast %cst_86 : f32 to vector<64x8xf32>
    %147 = arith.addf %146, %145 : vector<64x8xf32>
    %148 = tpu.reciprocal %147 {approx = true} : vector<64x8xf32> -> vector<64x8xf32>
    %149 = arith.mulf %142, %148 : vector<64x8xf32>
    %150 = vector.shape_cast %149 : vector<64x8xf32> to vector<8x8x8xf32>
    %151 = arith.truncf %150 : vector<8x8x8xf32> to vector<8x8x8xbf16>
    %c0_87 = arith.constant 0 : index
    %c0_88 = arith.constant 0 : index
    %c0_89 = arith.constant 0 : index
    %c0_90 = arith.constant 0 : index
    %152 = vector.load %arg14[%c0_87, %c0_88, %c0_89, %c0_90] : memref<1x8x8x8xbf16, #tpu.memory_space<vmem>>, vector<1x8x8x8xbf16>
    %153 = vector.shape_cast %152 : vector<1x8x8x8xbf16> to vector<8x8x8xbf16>
    %154 = vector.shape_cast %151 : vector<8x8x8xbf16> to vector<1x8x8x8xbf16>
    tpu.vector_store %arg14[%c0_87, %c0_88, %c0_89, %c0_90], %154 {strides = array<i32>} : memref<1x8x8x8xbf16, #tpu.memory_space<vmem>>, vector<1x8x8x8xbf16>,
    return
  }
  func.func @transform_0(%arg0: i32) -> (i32, i32, i32, i32) {
    %c0_i32 = arith.constant 0 : i32
    %c0_i32_0 = arith.constant 0 : i32
    %c0_i32_1 = arith.constant 0 : i32
    %c0_i32_2 = arith.constant 0 : i32
    return %arg0, %c0_i32, %c0_i32_0, %c0_i32_1 : i32, i32, i32, i32
  }
  func.func @transform_1(%arg0: i32) -> (i32, i32, i32) {
    %c0_i32 = arith.constant 0 : i32
    %c0_i32_0 = arith.constant 0 : i32
    %c0_i32_1 = arith.constant 0 : i32
    %c0_i32_2 = arith.constant 0 : i32
    return %c0_i32, %c0_i32_0, %c0_i32_1 : i32, i32, i32
  }
  func.func @transform_2(%arg0: i32) -> (i32, i32) {
    %c0_i32 = arith.constant 0 : i32
    %c0_i32_0 = arith.constant 0 : i32
    %c0_i32_1 = arith.constant 0 : i32
    return %c0_i32, %c0_i32_0 : i32, i32
  }
  func.func @transform_3(%arg0: i32) -> (i32, i32) {
    %c0_i32 = arith.constant 0 : i32
    %c0_i32_0 = arith.constant 0 : i32
    %c0_i32_1 = arith.constant 0 : i32
    return %c0_i32, %c0_i32_0 : i32, i32
  }
  func.func @transform_4(%arg0: i32) -> (i32, i32) {
    %c0_i32 = arith.constant 0 : i32
    %c0_i32_0 = arith.constant 0 : i32
    %c0_i32_1 = arith.constant 0 : i32
    return %c0_i32, %c0_i32_0 : i32, i32
  }
  func.func @transform_5(%arg0: i32) -> (i32, i32) {
    %c0_i32 = arith.constant 0 : i32
    %c0_i32_0 = arith.constant 0 : i32
    %c0_i32_1 = arith.constant 0 : i32
    return %c0_i32, %c0_i32_0 : i32, i32
  }
  func.func @transform_6(%arg0: i32) -> (i32, i32) {
    %c0_i32 = arith.constant 0 : i32
    %c0_i32_0 = arith.constant 0 : i32
    %c0_i32_1 = arith.constant 0 : i32
    return %c0_i32, %c0_i32_0 : i32, i32
  }
  func.func @transform_7(%arg0: i32) -> (i32, i32) {
    %c0_i32 = arith.constant 0 : i32
    %c0_i32_0 = arith.constant 0 : i32
    %c0_i32_1 = arith.constant 0 : i32
    return %c0_i32, %c0_i32_0 : i32, i32
  }
  func.func @transform_8(%arg0: i32) -> (i32, i32) {
    %c0_i32 = arith.constant 0 : i32
    %c0_i32_0 = arith.constant 0 : i32
    %c0_i32_1 = arith.constant 0 : i32
    return %c0_i32, %c0_i32_0 : i32, i32
  }
  func.func @transform_9(%arg0: i32) -> (i32, i32) {
    %c0_i32 = arith.constant 0 : i32
    %c0_i32_0 = arith.constant 0 : i32
    %c0_i32_1 = arith.constant 0 : i32
    return %c0_i32, %c0_i32_0 : i32, i32
  }
  func.func @transform_10(%arg0: i32) -> (i32, i32) {
    %c0_i32 = arith.constant 0 : i32
    %c0_i32_0 = arith.constant 0 : i32
    %c0_i32_1 = arith.constant 0 : i32
    return %c0_i32, %c0_i32_0 : i32, i32
  }
  func.func @transform_11(%arg0: i32) -> (i32, i32, i32) {
    %c0_i32 = arith.constant 0 : i32
    %c0_i32_0 = arith.constant 0 : i32
    %c0_i32_1 = arith.constant 0 : i32
    %c0_i32_2 = arith.constant 0 : i32
    return %c0_i32, %c0_i32_0, %c0_i32_1 : i32, i32, i32
  }
  func.func @transform_12(%arg0: i32) -> (i32, i32) {
    %c0_i32 = arith.constant 0 : i32
    %c0_i32_0 = arith.constant 0 : i32
    %c0_i32_1 = arith.constant 0 : i32
    return %c0_i32, %c0_i32_0 : i32, i32
  }
  func.func @transform_13(%arg0: i32) -> (i32, i32, i32, i32) {
    %c0_i32 = arith.constant 0 : i32
    %c0_i32_0 = arith.constant 0 : i32
    %c0_i32_1 = arith.constant 0 : i32
    %c0_i32_2 = arith.constant 0 : i32
    return %arg0, %c0_i32, %c0_i32_0, %c0_i32_1 : i32, i32, i32, i32
  }
}

</mosaic_0001>

<bundles_post_ra>
// kernel: csp_block_forward_pallas.1
= control target key start
LH: loop header
LB: loop body
LE: loop exit
PB: predicated region body
PF: predicated region fallthrough
CT: control target
= control target key end

     0   :  { %s4670_s0 = inlined_call_operand.vmem [shape: bf16[2,9,9,16], index: 0, kind: input, shape index: {}]   ;;  %s4671_s1 = inlined_call_operand.vmem [shape: bf16[3,12,8], index: 1, kind: input, shape index: {}]   ;;  %s4672_s2 = inlined_call_operand.vmem [shape: f32[1,8], index: 2, kind: input, shape index: {}]   ;;  %s4673_s3 = inlined_call_operand.vmem [shape: bf16[8,16], index: 3, kind: input, shape index: {}]   ;;  %s4674_s4 = inlined_call_operand.vmem [shape: f32[1,16], index: 4, kind: input, shape index: {}]   ;;  %s4675_s5 = inlined_call_operand.vmem [shape: bf16[8,8], index: 5, kind: input, shape index: {}]   ;;  %s4676_s6 = inlined_call_operand.vmem [shape: f32[1,8], index: 6, kind: input, shape index: {}]   ;;  %s4677_s7 = inlined_call_operand.vmem [shape: bf16[16,8], index: 7, kind: input, shape index: {}]   ;;  %s4678_s8 = inlined_call_operand.vmem [shape: f32[1,8], index: 8, kind: input, shape index: {}]   ;;  %s4679_s9 = inlined_call_operand.vmem [shape: bf16[8,8], index: 9, kind: input, shape index: {}]   ;;  %s4680_s10 = inlined_call_operand.vmem [shape: f32[1,8], index: 10, kind: input, shape index: {}]   ;;  %s4681_s11 = inlined_call_operand.vmem [shape: bf16[3,24,8], index: 11, kind: input, shape index: {}]   ;;  %s4682_s12 = inlined_call_operand.vmem [shape: f32[1,8], index: 12, kind: input, shape index: {}]   ;;  %s4683_s13 = inlined_call_operand.hbm [shape: bf16[2,8,8,8], index: 13, kind: output, shape index: {}]  }
   0x1   :  { %4684 = sst [smem:[#allocation7_spill]] %s4670_s0 }
   0x2   :  { %4685 = sst [smem:[#allocation8_spill]] %s4671_s1 }
   0x3   :  { %18 = vsyncpa [#allocation4], 0 }
   0x4   :  { %20 = vsyncpa [#allocation4 + $0x1], 0  ;;  %s3757_s25 = smov 0   ;;  %s3759_s26 = smov 0  }
   0x5   :  { %s3761_s27 = smov 0   ;;  %s3763_s28 = smov 0  }
   0x6 LB: > { %s3778_s29 = sadd.s32 4294967295, %s3678_s28   ;;  %s3002_s30 = sadd.s32 4294967294, %s3678_s28   ;;  %s3678_s28 = sphi %s3763_s28, %s4701_s28   ;;  %s3674_s27 = sphi %s3761_s27, %s4700_s27   ;;  %s3670_s26 = sphi %s3759_s26, %s4699_s26   ;;  %s3666_s25 = sphi %s3757_s25, %s4698_s25  }
   0x7   : > { %s3782_s14 = sadd.s32 1, %s3678_s28   ;;  %s311_s15 = sadd.s32 1, %s3674_s27 }
   0x8   : > { %s308_s16 = ssub.s32 %s3678_s28, %s3782_s14  ;;  %p321_p0 = scmp.ne.s32.totalorder %s3674_s27, %s3670_s26 }
   0x9   : > { %p309_p1 = scmp.eq.s32.totalorder %s308_s16, 0  ;;  %p322_p2 = scmp.eq.s32.totalorder %s3778_s29, 1 }
   0xa   : > { %p327_p3 = scmp.ne.s32.totalorder %s3670_s26, %s3666_s25  ;;  %p328_p4 = scmp.eq.s32.totalorder %s3002_s30, 1 }
   0xb   : > { %s3793_s17 = scalar_select %p309_p1, %s3674_s27, %s311_s15  }
   0xc   : > { %p3795_p5 = por %p322_p2, %p321_p0  ;;  %p3799_p6 = por %p328_p4, %p327_p3 }
   0xd   : > { %4686 = sst [smem:[#allocation6_spill]] %s3793_s17  ;;  %p3005_p7 = scmp.ge.s32.totalorder %s3678_s28, 1 }
   0xe   : > { %p390_p8 = scmp.lt.s32.totalorder %s3678_s28, 3 }
  0x10   : > { %p391_p9 = pnand %p3005_p7, %p390_p8 }
  0x11   : > { %p434_p10 = scmp.lt.s32.totalorder (!%p391_p9), %s3778_s29, 1  ;;  %s4689_s1 = sld [smem:[#allocation8_spill]] (!%p391_p9) }
  0x12   : > { %394 = sbr.rel (%p391_p9) target bundleno = 2208 (0x8a0), region = 72  ;;  %s4690_s0 = sld [smem:[#allocation7_spill]] (!%p391_p9) }
  0x13   : > { %s3680_s17 = smov (!%p391_p9), 120   ;;  %s3683_s24 = smov (!%p391_p9), 16  }
  0x14   : > { %s431_s16 = sand.u32 (!%p391_p9), 1, %s3670_s26  }
  0x15   : > { %s3006_s20 = sshll.u32 (!%p391_p9), %s431_s16, 5 }
  0x16   : > { %s433_s21 = scalar_lea.vmem (!%p391_p9), [#allocation3], %s3006_s20  ;;  %s3684_s20 = smov (!%p391_p9), [#allocation3]  }
  0x17   : > { %vm686_vm0 = vcmask 1045504   ;;  %v3392_v0 = vld [vmem:[%s4689_s1 + $0x8] sm:$0x3f]   ;;  %s435_s22 = scalar_select %p434_p10, %s3778_s29, 1  ;;  %v3393_v2 = vld [vmem:[%s4689_s1 + $0x10] sm:$0x3f]  }
  0x18   : > { %3320 = vmatprep.subr.msk.bf16.mxu0 %vm686_vm0, %v3392_v0  ;;  %v688_v1 = vsel %vm686_vm0, %v3392_v0, 0  ;;  %v3857_v20 = vsel %vm686_vm0, %v3393_v2, 0  ;;  %v3394_v32 = vld [vmem:[%s4689_s1] sm:$0x3f]   ;;  %vm578_vm1 = vcmask 64512   ;;  %vm673_vm2 = vcmask 97280  }
  0x19   : > { %s3329_s23 = smul.u32 72, %s435_s22  ;;  %3215 = vmatpush3.bf16.msra.mxu0 %v688_v1  ;;  %3321 = vmatprep.subr.msk.bf16.mxu1 %vm686_vm0, %v3394_v32  ;;  %v793_v45 = vsel %vm686_vm0, %v3394_v32, 0  ;;  %s3681_s22 = smov 8   ;;  %vm1066_vm3 = vcmask 1043456   ;;  %vm1187_vm4 = vcmask 60416   ;;  %vm1189_vm5 = vcmask 57344  }
  0x1a   : > { %3322 = vmatprep.subr.msk.bf16.mxu0 %vm686_vm0, %v3393_v2  ;;  %3225 = vmatpush3.bf16.msra.mxu1 %v793_v45  ;;  %vm1195_vm6 = vsmask.f32 256  ;;  %vm1227_vm7 = vsmask.f32 7938  ;;  %vm1746_vm11 = vcmask 130048   ;;  %vm1991_vm12 = vcmask 195584  }
  0x1b   : > { %s3815_s15 = scalar_lea.vmem %s4690_s0, %s3329_s23  ;;  %vm4026_vm8 = vmand %vm1189_vm5, %vm1195_vm6  ;;  %s2940_s23 = sshll.u32 %s433_s21, 4  ;;  %s4624_s23 = int_to_ptr.vmem [resolvable:$true] %s2940_s23 }
  0x1c   : > { %v3821_v3 = vld [vmem:[%s3815_s15 + $0x10] sm:$0xf]  ;;  %v3824_v4 = vld [vmem:[%s3815_s15] sm:$0xf]  ;;  %v441_v6 = vld [vmem:[%s3815_s15 + $0x4] sm:$0x1] }
  0x1d   : > { %v3018_v5 = vcombine.low %v3821_v3, %v3821_v3  ;;  %v3016_v7 = vcombine.low %v3824_v4, %v3824_v4  ;;  %v3832_v8 = vld [vmem:[%s3815_s15 + $0x18] sm:$0xf]  ;;  %v3835_v9 = vld [vmem:[%s3815_s15 + $0x8] sm:$0xf]  ;;  %v445_v10 = vld [vmem:[%s3815_s15 + $0x14] sm:$0x1]  ;;  %v3008_v11 = vcombine.low %v3824_v4, %v441_v6 }
  0x1e   : > { %v3019_v12 = vcombine.low %v3832_v8, %v3832_v8  ;;  %v3017_v13 = vcombine.low %v3835_v9, %v3835_v9  ;;  %v443_v14 = vld [vmem:[%s3815_s15 + $0xc] sm:$0x1]  ;;  %v3848_v15 = vld [vmem:[%s3815_s15 + $0x28] sm:$0xf]  ;;  %v3851_v16 = vld [vmem:[%s3815_s15 + $0x20] sm:$0xf]  ;;  %v3010_v19 = vcombine.low %v3821_v3, %v445_v10 }
  0x1f   : > { %609 = vrot.lane.b32.xlu1 %v3018_v5, %s3680_s17  ;;  %605 = vrot.lane.b32.xlu0 %v3016_v7, %s3680_s17  ;;  %v3009_v17 = vcombine.low %v3835_v9, %v443_v14  ;;  %v447_v18 = vld [vmem:[%s3815_s15 + $0x1c] sm:$0x1]  ;;  %v501_v21 = vshll.u32 %v3008_v11, 16  ;;  %v3021_v23 = vcombine.low %v3848_v15, %v3848_v15  ;;  %v3020_v24 = vcombine.low %v3851_v16, %v3851_v16  ;;  %v3867_v25 = vld [vmem:[%s3815_s15 + $0x38] sm:$0xf]  ;;  %vm4033_vm9 = vmand %vm1189_vm5, %vm1227_vm7 }
  0x20   : > { %v3011_v22 = vcombine.low %v3832_v8, %v447_v18  ;;  %v451_v27 = vld [vmem:[%s3815_s15 + $0x2c] sm:$0x1]  ;;  %v3871_v28 = vld [vmem:[%s3815_s15 + $0x30] sm:$0xf]  ;;  %v449_v29 = vld [vmem:[%s3815_s15 + $0x24] sm:$0x1]  ;;  %v3023_v33 = vcombine.low %v3867_v25, %v3867_v25 }
  0x21   : > { %v508_v26 = vshll.u32 %v3009_v17, 16  ;;  %v499_v30 = vshrl.u32 %v3008_v11, 16  ;;  %v515_v31 = vshll.u32 %v3010_v19, 16  ;;  %v503_v34 = vrot.slane %v501_v21, 1  ;;  %v455_v41 = vld [vmem:[%s3815_s15 + $0x3c] sm:$0x1]  ;;  %vm4142_vm10 = vmand %vm1187_vm4, %vm1227_vm7 }
  0x22   : > { %v522_v35 = vshll.u32 %v3011_v22, 16  ;;  %v3013_v36 = vcombine.low %v3848_v15, %v451_v27  ;;  %v3022_v37 = vcombine.low %v3871_v28, %v3871_v28  ;;  %v506_v38 = vshrl.u32 %v3009_v17, 16  ;;  %v453_v42 = vld [vmem:[%s3815_s15 + $0x34] sm:$0x1]  ;;  %v3894_v54 = vld [vmem:[%s3815_s15 + $0x40] sm:$0xf] }
  0x23   : > { %611 = vrot.lane.b32.xlu1 %v3019_v12, %s3680_s17  ;;  %607 = vrot.lane.b32.xlu0 %v3017_v13, %s3680_s17  ;;  %v510_v39 = vrot.slane %v508_v26, 1  ;;  %v3012_v40 = vcombine.low %v3851_v16, %v449_v29  ;;  %v520_v43 = vshrl.u32 %v3011_v22, 16  ;;  %v513_v44 = vshrl.u32 %v3010_v19, 16  ;;  %v457_v55 = vld [vmem:[%s3815_s15 + $0x44] sm:$0x1]  ;;  %s3618_s15 = scalar_lea.vmem %s4624_s23, 512 }
  0x24   : > { %v504_v46 = vor.u32 %v503_v34, %v499_v30  ;;  %v524_v47 = vrot.slane %v522_v35, 1  ;;  %v517_v48 = vrot.slane %v515_v31, 1  ;;  %v536_v49 = vshll.u32 %v3013_v36, 16  ;;  %p3619_p11 = scmp.ne.s32.totalorder %s4624_s23, %s3618_s15 }
  0x25   : > { %v511_v50 = vor.u32 %v510_v39, %v506_v38  ;;  %v529_v51 = vshll.u32 %v3012_v40, 16  ;;  %v3015_v52 = vcombine.low %v3867_v25, %v455_v41  ;;  %v3014_v53 = vcombine.low %v3871_v28, %v453_v42 }
  0x26   : > { %v534_v56 = vshrl.u32 %v3013_v36, 16  ;;  %v518_v57 = vor.u32 %v517_v48, %v513_v44  ;;  %v538_v58 = vrot.slane %v536_v49, 1  ;;  %v527_v59 = vshrl.u32 %v3012_v40, 16  ;;  %p3620_p12 = pnand %p3619_p11, %p3795_p5 }
  0x27   : > { %615 = vrot.lane.b32.xlu1 %v3021_v23, %s3680_s17  ;;  %613 = vrot.lane.b32.xlu0 %v3020_v24, %s3680_s17  ;;  %v3044_v60 = vcombine.low %v3894_v54, %v457_v55  ;;  %v525_v61 = vor.u32 %v524_v47, %v520_v43  ;;  %v531_v62 = vrot.slane %v529_v51, 1  ;;  %v550_v63 = vshll.u32 %v3015_v52, 16 }
  0x28   : > { %v543_v0 = vshll.u32 %v3014_v53, 16  ;;  %v539_v1 = vor.u32 %v538_v58, %v534_v56  ;;  %v548_v2 = vshrl.u32 %v3015_v52, 16  ;;  %v541_v5 = vshrl.u32 %v3014_v53, 16  ;;  %p3621_p13 = pneg %p3620_p12 }
  0x29   : > { %v532_v6 = vor.u32 %v531_v62, %v527_v59  ;;  %v552_v7 = vrot.slane %v550_v63, 1  ;;  %v868_v11 = vshll.u32 %v3044_v60, 16  ;;  %v866_v14 = vshrl.u32 %v3044_v60, 16 }
  0x2a   : > { %v545_v10 = vrot.slane %v543_v0, 1 }
  0x2b   : > { %619 = vrot.lane.b32.xlu1 %v3023_v33, %s3680_s17  ;;  %617 = vrot.lane.b32.xlu0 %v3022_v37, %s3680_s17  ;;  %v553_v12 = vor.u32 %v552_v7, %v548_v2  ;;  %v870_v17 = vrot.slane %v868_v11, 1 }
  0x2c   : > { %v546_v13 = vor.u32 %v545_v10, %v541_v5 }
  0x2d   : > { %v871_v18 = vor.u32 %v870_v17, %v866_v14  ;;  %v3056_v14 = vld [vmem:[%s4672_s2] ss:$0 sm:$0xff] }
  0x2f   : > { %556 = vrot.lane.b32.xlu1 %v511_v50, %s3681_s22  ;;  %554 = vrot.lane.b32.xlu0 %v504_v46, %s3681_s22 }
  0x33   : > { %560 = vrot.lane.b32.xlu1 %v525_v61, %s3681_s22  ;;  %558 = vrot.lane.b32.xlu0 %v518_v57, %s3681_s22 }
  0x37   : > { %564 = vrot.lane.b32.xlu1 %v539_v1, %s3681_s22  ;;  %562 = vrot.lane.b32.xlu0 %v532_v6, %s3681_s22 }
  0x3b   : > { %568 = vrot.lane.b32.xlu1 %v553_v12, %s3681_s22  ;;  %566 = vrot.lane.b32.xlu0 %v546_v13, %s3681_s22 }
  0x3f   : > { %872 = vrot.lane.b32.xlu0 %v871_v18, %s3681_s22 }
  0x91   : > { %v610_v19 = vpop.permute.xlu1 %609  ;;  %v606_v21 = vpop.permute.xlu0 %605 }
  0x92   : > { %v634_v24 = vsel %vm578_vm1, %v610_v19, %v518_v57  ;;  %v630_v26 = vsel %vm578_vm1, %v606_v21, %v504_v46 }
  0x95   : > { %v612_v22 = vpop.permute.xlu1 %611  ;;  %v608_v23 = vpop.permute.xlu0 %607 }
  0x96   : > { %v636_v27 = vsel %vm578_vm1, %v612_v22, %v525_v61  ;;  %v632_v29 = vsel %vm578_vm1, %v608_v23, %v511_v50 }
  0x97   : > { %v3027_v30 = vcombine.low %v634_v24, %v636_v27  ;;  %v3026_v31 = vcombine.low %v630_v26, %v632_v29 }
  0x99   : > { %v616_v32 = vpop.permute.xlu1 %615  ;;  %v614_v33 = vpop.permute.xlu0 %613  ;;  %3216 = vmatprep.mubr.msk.bf16.mxu0 %vm673_vm2, %v3026_v31 }
  0x9a   : > { %v640_v34 = vsel %vm578_vm1, %v616_v32, %v539_v1  ;;  %v638_v35 = vsel %vm578_vm1, %v614_v33, %v532_v6  ;;  %3217 = vmatmul.mubr.msk.bf16.vlgmr.msra.gmra.mxu0 %vm673_vm2, %v3027_v30 }
  0x9b   : > { %v3028_v36 = vcombine.low %v638_v35, %v640_v34  ;;  %3235 = vmatpush3.bf16.msra.mxu0 %v3857_v20 }
  0x9d   : > { %v620_v37 = vpop.permute.xlu1 %619  ;;  %v618_v38 = vpop.permute.xlu0 %617  ;;  %3220 = vmatprep.mubr.msk.bf16.mxu0 %vm673_vm2, %v3028_v36 }
  0x9e   : > { %v644_v39 = vsel %vm578_vm1, %v620_v37, %v553_v12  ;;  %v642_v40 = vsel %vm578_vm1, %v618_v38, %v546_v13 }
  0x9f   : > { %v3029_v41 = vcombine.low %v642_v40, %v644_v39 }
  0xa1   : > { %v557_v42 = vpop.permute.xlu1 %556  ;;  %v555_v43 = vpop.permute.xlu0 %554 }
  0xa2   : > { %v582_v44 = vsel %vm578_vm1, %v3835_v9, %v557_v42  ;;  %v580_v45 = vsel %vm578_vm1, %v3824_v4, %v555_v43  ;;  %3221 = vmatmul.mubr.msk.bf16.gmra.mxu0 %vm673_vm2, %v3029_v41 }
  0xa3   : > { %v3035_v20 = vcombine.low %v580_v45, %v582_v44 }
  0xa5   : > { %v561_v46 = vpop.permute.xlu1 %560  ;;  %3226 = vmatprep.mubr.msk.bf16.mxu1 %vm673_vm2, %v3035_v20  ;;  %v559_v47 = vpop.permute.xlu0 %558 }
  0xa6   : > { %v586_v48 = vsel %vm578_vm1, %v3832_v8, %v561_v46  ;;  %v584_v49 = vsel %vm578_vm1, %v3821_v3, %v559_v47 }
  0xa7   : > { %v3036_v50 = vcombine.low %v584_v49, %v586_v48  ;;  %v3047_v51 = vcombine.low %v582_v44, %v584_v49 }
  0xa9   : > { %v565_v52 = vpop.permute.xlu1 %564  ;;  %3227 = vmatmul.mubr.msk.bf16.vlgmr.msra.gmra.mxu1 %vm673_vm2, %v3036_v50  ;;  %v563_v9 = vpop.permute.xlu0 %562  ;;  %3236 = vmatprep.mubr.msk.bf16.mxu0 %vm673_vm2, %v3047_v51 }
  0xaa   : > { %v590_v4 = vsel %vm578_vm1, %v3848_v15, %v565_v52  ;;  %v588_v53 = vsel %vm578_vm1, %v3851_v16, %v563_v9 }
  0xab   : > { %v3037_v55 = vcombine.low %v588_v53, %v590_v4  ;;  %v3048_v56 = vcombine.low %v586_v48, %v588_v53 }
  0xad   : > { %v569_v8 = vpop.permute.xlu1 %568  ;;  %3230 = vmatprep.mubr.msk.bf16.mxu1 %vm673_vm2, %v3037_v55  ;;  %v567_v3 = vpop.permute.xlu0 %566  ;;  %3237 = vmatmul.mubr.msk.bf16.vlgmr.msra.gmra.mxu0 %vm673_vm2, %v3048_v56 }
  0xae   : > { %v594_v57 = vsel %vm578_vm1, %v3867_v25, %v569_v8  ;;  %v592_v58 = vsel %vm578_vm1, %v3871_v28, %v567_v3  ;;  %v1046_v25 = vld [vmem:[%s4673_s3] sm:$0xf] }
  0xaf   : > { %v3038_v59 = vcombine.low %v592_v58, %v594_v57  ;;  %v3049_v60 = vcombine.low %v590_v4, %v592_v58  ;;  %3323 = vmatprep.subr.msk.bf16.mxu1 %vm1066_vm3, %v1046_v25  ;;  %v1068_v28 = vsel %vm1066_vm3, %v1046_v25, 0 }
  0xb0   : > { %3245 = vmatpush3.bf16.msra.mxu1 %v1068_v28 }
  0xb1   : > { %3231 = vmatmul.mubr.msk.bf16.gmra.mxu1 %vm673_vm2, %v3038_v59  ;;  %v873_v15 = vpop.permute.xlu0 %872  ;;  %3240 = vmatprep.mubr.msk.bf16.mxu0 %vm673_vm2, %v3049_v60 }
  0xb2   : > { %v876_v16 = vsel %vm578_vm1, %v3894_v54, %v873_v15 }
  0xb3   : > { %v3050_v61 = vcombine.low %v594_v57, %v876_v16 }
  0xb5   : > { %3241 = vmatmul.mubr.msk.bf16.gmra.mxu0 %vm673_vm2, %v3050_v61 }
 0x15a   : > { %v3218_v62 = vpop.f32.mrf.mxu0 }
 0x15c   : > { %v724_v63 = vpop.f32.mrf.mxu0 }
 0x15e   : > { %v3219_v0 = vpop.f32.mrf.mxu0 }
 0x160   : > { %v727_v1 = vpop.f32.mrf.mxu0 }
 0x162   : > { %v3222_v2 = vpop.f32.mrf.mxu0 }
 0x164   : > { %v740_v5 = vpop.f32.mrf.mxu0 }
 0x166   : > { %v3223_v54 = vpop.f32.mrf.mxu0 }
 0x168   : > { %v743_v7 = vpop.f32.mrf.mxu0 }
 0x169   : > { %v3228_v6 = vpop.f32.mrf.mxu1 }
 0x16a   : > { %v838_v11 = vadd.f32 %v3228_v6, %v3218_v62 }
 0x16b   : > { %v829_v10 = vpop.f32.mrf.mxu1 }
 0x16c   : > { %v830_v17 = vadd.f32 %v829_v10, %v724_v63 }
 0x16d   : > { %v3229_v12 = vpop.f32.mrf.mxu1  ;;  %v3238_v13 = vpop.f32.mrf.mxu0 }
 0x16e   : > { %v973_v18 = vadd.f32 %v3238_v13, %v838_v11  ;;  %v841_v22 = vadd.f32 %v3229_v12, %v3219_v0 }
 0x16f   : > { %v832_v19 = vpop.f32.mrf.mxu1  ;;  %v940_v21 = vpop.f32.mrf.mxu0 }
 0x170   : > { %v3954_v23 = vadd.f32 %v3056_v14, %v973_v18  ;;  %v971_v24 = vadd.f32 %v940_v21, %v830_v17  ;;  %v833_v32 = vadd.f32 %v832_v19, %v727_v1 }
 0x171   : > { %v3232_v26 = vpop.f32.mrf.mxu1  ;;  %v3239_v27 = vpop.f32.mrf.mxu0 }
 0x172   : > { %v996_v29 = vsub.f32 0.0, %v3954_v23  ;;  %v3957_v30 = vadd.f32 %v3056_v14, %v971_v24  ;;  %v974_v31 = vadd.f32 %v3239_v27, %v841_v22  ;;  %v854_v38 = vadd.f32 %v3232_v26, %v3222_v2 }
 0x173   : > { %v845_v33 = vpop.f32.mrf.mxu1  ;;  %v943_v34 = vpop.f32.mrf.mxu0 }
 0x174   : > { %v1006_v35 = vmul.f32 1.442695, %v996_v29  ;;  %v994_v36 = vsub.f32 0.0, %v3957_v30  ;;  %v3960_v37 = vadd.f32 %v3056_v14, %v974_v31  ;;  %v972_v39 = vadd.f32 %v943_v34, %v833_v32 }
 0x175   : > { %v3233_v40 = vpop.f32.mrf.mxu1  ;;  %v3242_v41 = vpop.f32.mrf.mxu0  ;;  %v846_v44 = vadd.f32 %v845_v33, %v740_v5 }
 0x176   : > { %v1002_v42 = vmul.f32 1.442695, %v994_v36  ;;  %v997_v43 = vsub.f32 0.0, %v3960_v37  ;;  %3426 = vpow2.f32 %v1006_v35  ;;  %v3963_v45 = vadd.f32 %v3056_v14, %v972_v39 }
 0x177   : > { %v977_v20 = vadd.f32 %v3242_v41, %v854_v38  ;;  %v848_v46 = vpop.f32.mrf.mxu1  ;;  %v956_v47 = vpop.f32.mrf.mxu0  ;;  %v857_v49 = vadd.f32 %v3233_v40, %v3223_v54 }
 0x178   : > { %3428 = vpow2.f32 %v1002_v42  ;;  %v1008_v48 = vmul.f32 1.442695, %v997_v43  ;;  %v975_v50 = vadd.f32 %v956_v47, %v846_v44  ;;  %v995_v51 = vsub.f32 0.0, %v3963_v45 }
 0x179   : > { %v3966_v52 = vadd.f32 %v3056_v14, %v977_v20  ;;  %v3243_v9 = vpop.f32.mrf.mxu0  ;;  %v849_v4 = vadd.f32 %v848_v46, %v743_v7 }
 0x17a   : > { %3430 = vpow2.f32 %v1008_v48  ;;  %v990_v53 = vadd.f32 %v3056_v14, %v975_v50  ;;  %v978_v55 = vadd.f32 %v3243_v9, %v857_v49  ;;  %v1004_v56 = vmul.f32 1.442695, %v995_v51 }
 0x17b   : > { %v1000_v8 = vsub.f32 0.0, %v3966_v52  ;;  %v959_v3 = vpop.f32.mrf.mxu0 }
 0x17c   : > { %v998_v57 = vsub.f32 0.0, %v990_v53  ;;  %v993_v58 = vadd.f32 %v3056_v14, %v978_v55  ;;  %v976_v59 = vadd.f32 %v959_v3, %v849_v4  ;;  %3432 = vpow2.f32 %v1004_v56 }
 0x17d   : > { %v1014_v60 = vmul.f32 1.442695, %v1000_v8 }
 0x17e   : > { %v1010_v15 = vmul.f32 1.442695, %v998_v57  ;;  %v1001_v16 = vsub.f32 0.0, %v993_v58  ;;  %v991_v61 = vadd.f32 %v3056_v14, %v976_v59 }
 0x17f   : > { %3434 = vpow2.f32 %v1014_v60 }
 0x180   : > { %3436 = vpow2.f32 %v1010_v15  ;;  %v1016_v25 = vmul.f32 1.442695, %v1001_v16  ;;  %v999_v28 = vsub.f32 0.0, %v991_v61 }
 0x182   : > { %3438 = vpow2.f32 %v1016_v25  ;;  %v1012_v62 = vmul.f32 1.442695, %v999_v28 }
 0x183   : > { %v3427_v63 = vpop.eup %3426 }
 0x184   : > { %3440 = vpow2.f32 %v1012_v62  ;;  %v1020_v5 = vadd.f32 1.0, %v3427_v63 }
 0x185   : > { %v3429_v0 = vpop.eup %3428 }
 0x186   : > { %v1018_v2 = vadd.f32 1.0, %v3429_v0 }
 0x187   : > { %v3431_v1 = vpop.eup %3430 }
 0x188   : > { %v1021_v54 = vadd.f32 1.0, %v3431_v1 }
 0x189   : > { %v3433_v6 = vpop.eup %3432 }
 0x18a   : > { %3442 = vrcp.f32 %v1021_v54  ;;  %v1019_v7 = vadd.f32 1.0, %v3433_v6 }
 0x18b   : > { %3444 = vrcp.f32 %v1018_v2 }
 0x18c   : > { %v3435_v10 = vpop.eup %3434  ;;  %3446 = vrcp.f32 %v1020_v5 }
 0x18d   : > { %v3437_v11 = vpop.eup %3436  ;;  %3448 = vrcp.f32 %v1019_v7  ;;  %v1024_v14 = vadd.f32 1.0, %v3435_v10 }
 0x18e   : > { %v1022_v12 = vadd.f32 1.0, %v3437_v11 }
 0x18f   : > { %v3439_v13 = vpop.eup %3438 }
 0x190   : > { %v1025_v17 = vadd.f32 1.0, %v3439_v13  ;;  %3450 = vrcp.f32 %v1022_v12 }
 0x191   : > { %v3441_v18 = vpop.eup %3440 }
 0x192   : > { %3452 = vrcp.f32 %v1025_v17  ;;  %v1023_v19 = vadd.f32 1.0, %v3441_v18 }
 0x193   : > { %3454 = vrcp.f32 %v1024_v14 }
 0x194   : > { %3456 = vrcp.f32 %v1023_v19 }
 0x197   : > { %v3443_v21 = vpop.eup %3442 }
 0x198   : > { %v3445_v22 = vpop.eup %3444  ;;  %v1037_v27 = vmul.f32 %v3443_v21, %v3960_v37 }
 0x199   : > { %v3447_v24 = vpop.eup %3446  ;;  %v1034_v29 = vmul.f32 %v3445_v22, %v3957_v30 }
 0x19a   : > { %v3449_v26 = vpop.eup %3448  ;;  %v1036_v32 = vmul.f32 %v3447_v24, %v3954_v23  ;;  %v1259_v23 = vld [vmem:[%s4679_s9] sm:$0xf] }
 0x19b   : > { %v1035_v31 = vmul.f32 %v3449_v26, %v3963_v45  ;;  %3324 = vmatprep.subr.msk.bf16.mxu0 %vm1066_vm3, %v1259_v23  ;;  %v1292_v44 = vsel %vm1066_vm3, %v1259_v23, 0  ;;  %v3057_v45 = vld [vmem:[%s4674_s4] ss:$0 sm:$0xff] }
 0x19c   : > { %v1043_v35 = vpack.c.bf16 %v1037_v27, %v1036_v32  ;;  %3255 = vmatpush3.bf16.msra.mxu0 %v1292_v44 }
 0x19d   : > { %v1042_v33 = vpack.c.bf16 %v1035_v31, %v1034_v29  ;;  %v3451_v34 = vpop.eup %3450 }
 0x19e   : > { %v1038_v40 = vmul.f32 %v3451_v34, %v990_v53 }
 0x19f   : > { %v3453_v36 = vpop.eup %3452  ;;  %3246 = vmatprep.mubr.msk.bf16.mxu1 %vm578_vm1, %v1042_v33 }
 0x1a0   : > { %v3455_v38 = vpop.eup %3454  ;;  %3247 = vmatmul.mubr.msk.bf16.vlgmr.msra.gmra.mxu1 %vm578_vm1, %v1043_v35  ;;  %v1041_v41 = vmul.f32 %v3453_v36, %v993_v58 }
 0x1a1   : > { %v3457_v39 = vpop.eup %3456  ;;  %v1040_v37 = vmul.f32 %v3455_v38, %v3966_v52 }
 0x1a2   : > { %v1039_v42 = vmul.f32 %v3457_v39, %v991_v61 }
 0x1a3   : > { %v1045_v43 = vpack.c.bf16 %v1041_v41, %v1040_v37  ;;  %v1238_v37 = vld [vmem:[#allocation2 + $0x1c] sm:$0x1] }
 0x1a4   : > { %v1044_v30 = vpack.c.bf16 %v1039_v42, %v1038_v40  ;;  %v1206_v42 = vld [vmem:[#allocation2 + $0x18] sm:$0x1] }
 0x1a6   : > { %3250 = vmatprep.mubr.msk.bf16.mxu1 %vm578_vm1, %v1044_v30  ;;  %v3682_v30 = vmov 0  }
 0x1a7   : > { %1188 = vst.msk [vmem:[#allocation2] sm:$0xf] %vm1187_vm4, %v3682_v30  ;;  %1192 = vst.msk [vmem:[#allocation2 + $0x48] sm:$0xf] %vm1187_vm4, %v3682_v30 }
 0x1a8   : > { %3251 = vmatmul.mubr.msk.bf16.gmra.mxu1 %vm578_vm1, %v1045_v43  ;;  %1190 = vst.msk [vmem:[#allocation2 + $0x4] sm:$0x1] %vm1189_vm5, %v3682_v30  ;;  %1193 = vst.msk [vmem:[#allocation2 + $0x4c] sm:$0x1] %vm1189_vm5, %v3682_v30 }
 0x260   : > { %v3248_v20 = vpop.f32.mrf.mxu1 }
 0x261   : > { %v3986_v46 = vadd.f32 %v3248_v20, %v3057_v45 }
 0x262   : > { %v1104_v47 = vpop.f32.mrf.mxu1 }
 0x263   : > { %v1137_v48 = vsub.f32 0.0, %v3986_v46  ;;  %v3989_v49 = vadd.f32 %v3057_v45, %v1104_v47  ;;  %v1239_v47 = vsel %vm4033_vm9, 0, %v1238_v37  ;;  %v1247_v37 = vld [vmem:[#allocation2 + $0x34] sm:$0x1] }
 0x264   : > { %v3249_v50 = vpop.f32.mrf.mxu1  ;;  %1240 = vst [vmem:[#allocation2 + $0x1c] sm:$0x1] %v1239_v47 }
 0x265   : > { %v1147_v51 = vmul.f32 1.442695, %v1137_v48  ;;  %v1135_v52 = vsub.f32 0.0, %v3989_v49  ;;  %v1116_v9 = vadd.f32 %v3249_v50, %v3057_v45 }
 0x266   : > { %v1107_v4 = vpop.f32.mrf.mxu1 }
 0x267   : > { %3458 = vpow2.f32 %v1147_v51  ;;  %v1143_v53 = vmul.f32 1.442695, %v1135_v52  ;;  %v1138_v55 = vsub.f32 0.0, %v1116_v9  ;;  %v1108_v56 = vadd.f32 %v3057_v45, %v1107_v4 }
 0x268   : > { %v3252_v8 = vpop.f32.mrf.mxu1 }
 0x269   : > { %3460 = vpow2.f32 %v1143_v53  ;;  %v1149_v3 = vmul.f32 1.442695, %v1138_v55  ;;  %v1136_v57 = vsub.f32 0.0, %v1108_v56  ;;  %v3992_v58 = vadd.f32 %v3252_v8, %v3057_v45  ;;  %v1229_v53 = vld [vmem:[#allocation2 + $0x4] sm:$0x1] }
 0x26a   : > { %v1120_v59 = vpop.f32.mrf.mxu1  ;;  %v1256_v55 = vld [vmem:[#allocation2 + $0x4c] sm:$0x1]  ;;  %v1230_v8 = vsel %vm4033_vm9, 0, %v1229_v53 }
 0x26b   : > { %3462 = vpow2.f32 %v1149_v3  ;;  %v1145_v60 = vmul.f32 1.442695, %v1136_v57  ;;  %v1141_v15 = vsub.f32 0.0, %v3992_v58  ;;  %v3995_v16 = vadd.f32 %v3057_v45, %v1120_v59  ;;  %1231 = vst [vmem:[#allocation2 + $0x4] sm:$0x1] %v1230_v8 }
 0x26c   : > { %v3253_v61 = vpop.f32.mrf.mxu1  ;;  %v1257_v3 = vsel %vm4033_vm9, 0, %v1256_v55 }
 0x26d   : > { %3464 = vpow2.f32 %v1145_v60  ;;  %v1155_v25 = vmul.f32 1.442695, %v1141_v15  ;;  %v1139_v28 = vsub.f32 0.0, %v3995_v16  ;;  %v3998_v62 = vadd.f32 %v3253_v61, %v3057_v45  ;;  %1258 = vst [vmem:[#allocation2 + $0x4c] sm:$0x1] %v1257_v3 }
 0x26e   : > { %v1123_v63 = vpop.f32.mrf.mxu1  ;;  %v1197_v15 = vld [vmem:[#allocation2] sm:$0x1]  ;;  %v1200_v61 = vld [vmem:[#allocation2 + $0x8] sm:$0x1] }
 0x26f   : > { %3466 = vpow2.f32 %v1155_v25  ;;  %v1151_v0 = vmul.f32 1.442695, %v1139_v28  ;;  %v1142_v1 = vsub.f32 0.0, %v3998_v62  ;;  %v4001_v2 = vadd.f32 %v3057_v45, %v1123_v63  ;;  %v1232_v25 = vld [vmem:[#allocation2 + $0xc] sm:$0x1] }
 0x270   : > { %v1207_v45 = vsel %vm4026_vm8, 0, %v1206_v42  ;;  %v1201_v28 = vsel %vm4026_vm8, 0, %v1200_v61  ;;  %v1209_v63 = vld [vmem:[#allocation2 + $0x20] sm:$0x1] }
 0x271   : > { %3468 = vpow2.f32 %v1151_v0  ;;  %v1157_v5 = vmul.f32 1.442695, %v1142_v1  ;;  %v1140_v54 = vsub.f32 0.0, %v4001_v2  ;;  %1208 = vst [vmem:[#allocation2 + $0x18] sm:$0x1] %v1207_v45  ;;  %v1210_v1 = vsel %vm4026_vm8, 0, %v1209_v63 }
 0x272   : > { %1202 = vst [vmem:[#allocation2 + $0x8] sm:$0x1] %v1201_v28  ;;  %v1241_v0 = vld [vmem:[#allocation2 + $0x24] sm:$0x1]  ;;  %1211 = vst [vmem:[#allocation2 + $0x20] sm:$0x1] %v1210_v1 }
 0x273   : > { %3470 = vpow2.f32 %v1157_v5  ;;  %v1153_v6 = vmul.f32 1.442695, %v1140_v54  ;;  %v1203_v5 = vld [vmem:[#allocation2 + $0x10] sm:$0x1]  ;;  %v1235_v54 = vld [vmem:[#allocation2 + $0x14] sm:$0x1] }
 0x274   : > { %v3459_v7 = vpop.eup %3458 }
 0x275   : > { %v1161_v10 = vadd.f32 1.0, %v3459_v7  ;;  %3472 = vpow2.f32 %v1153_v6  ;;  %v1204_v6 = vsel %vm4026_vm8, 0, %v1203_v5  ;;  %v1236_v7 = vsel %vm4033_vm9, 0, %v1235_v54 }
 0x276   : > { %v3461_v11 = vpop.eup %3460  ;;  %1205 = vst [vmem:[#allocation2 + $0x10] sm:$0x1] %v1204_v6  ;;  %1237 = vst [vmem:[#allocation2 + $0x14] sm:$0x1] %v1236_v7 }
 0x277   : > { %v1159_v12 = vadd.f32 1.0, %v3461_v11  ;;  %3474 = vrcp.f32 %v1161_v10  ;;  %v1218_v11 = vld [vmem:[#allocation2 + $0x38] sm:$0x1] }
 0x278   : > { %v3463_v13 = vpop.eup %3462 }
 0x279   : > { %v1162_v14 = vadd.f32 1.0, %v3463_v13  ;;  %3476 = vrcp.f32 %v1159_v12  ;;  %v1250_v12 = vld [vmem:[#allocation2 + $0x3c] sm:$0x1]  ;;  %v1219_v13 = vsel %vm4026_vm8, 0, %v1218_v11 }
 0x27a   : > { %v3465_v17 = vpop.eup %3464  ;;  %1220 = vst [vmem:[#allocation2 + $0x38] sm:$0x1] %v1219_v13 }
 0x27b   : > { %3478 = vrcp.f32 %v1162_v14  ;;  %v1160_v18 = vadd.f32 1.0, %v3465_v17  ;;  %v1251_v14 = vsel %vm4033_vm9, 0, %v1250_v12  ;;  %v1571_v17 = vld [vmem:[#allocation2 + $0x4] sm:$0x1] }
 0x27c   : > { %v3467_v19 = vpop.eup %3466  ;;  %1252 = vst [vmem:[#allocation2 + $0x3c] sm:$0x1] %v1251_v14 }
 0x27d   : > { %3480 = vrcp.f32 %v1160_v18  ;;  %v1165_v21 = vadd.f32 1.0, %v3467_v19  ;;  %v1212_v19 = vld [vmem:[#allocation2 + $0x28] sm:$0x1] }
 0x27e   : > { %v3469_v22 = vpop.eup %3468 }
 0x27f   : > { %v1163_v24 = vadd.f32 1.0, %v3469_v22  ;;  %3482 = vrcp.f32 %v1165_v21  ;;  %v1244_v21 = vld [vmem:[#allocation2 + $0x2c] sm:$0x1]  ;;  %v1213_v22 = vsel %vm4026_vm8, 0, %v1212_v19  ;;  %v1224_v19 = vld [vmem:[#allocation2 + $0x48] sm:$0x1] }
 0x280   : > { %v3471_v26 = vpop.eup %3470  ;;  %1214 = vst [vmem:[#allocation2 + $0x28] sm:$0x1] %v1213_v22  ;;  %v1225_v22 = vsel %vm4026_vm8, 0, %v1224_v19 }
 0x281   : > { %v1166_v27 = vadd.f32 1.0, %v3471_v26  ;;  %3484 = vrcp.f32 %v1163_v24  ;;  %v1245_v24 = vsel %vm4033_vm9, 0, %v1244_v21  ;;  %1226 = vst [vmem:[#allocation2 + $0x48] sm:$0x1] %v1225_v22 }
 0x282   : > { %v3473_v29 = vpop.eup %3472  ;;  %1246 = vst [vmem:[#allocation2 + $0x2c] sm:$0x1] %v1245_v24 }
 0x283   : > { %3486 = vrcp.f32 %v1166_v27  ;;  %v1164_v31 = vadd.f32 1.0, %v3473_v29  ;;  %v1221_v29 = vld [vmem:[#allocation2 + $0x40] sm:$0x1] }
 0x284   : > { %v3475_v32 = vpop.eup %3474 }
 0x285   : > { %3488 = vrcp.f32 %v1164_v31  ;;  %v4005_v35 = vmul.f32 %v3475_v32, %v3986_v46  ;;  %v1253_v31 = vld [vmem:[#allocation2 + $0x44] sm:$0x1]  ;;  %v1222_v32 = vsel %vm4026_vm8, 0, %v1221_v29 }
 0x286   : > { %v3477_v33 = vpop.eup %3476  ;;  %1223 = vst [vmem:[#allocation2 + $0x40] sm:$0x1] %v1222_v32 }
 0x287   : > { %v4010_v39 = vmul.f32 %v3477_v33, %v3989_v49  ;;  %v1254_v33 = vsel %vm4033_vm9, 0, %v1253_v31 }
 0x288   : > { %v3479_v34 = vpop.eup %3478  ;;  %1255 = vst [vmem:[#allocation2 + $0x44] sm:$0x1] %v1254_v33 }
 0x289   : > { %v4007_v36 = vmul.f32 %v3479_v34, %v1116_v9 }
 0x28a   : > { %v3481_v38 = vpop.eup %3480 }
 0x28b   : > { %v4012_v40 = vmul.f32 %v3481_v38, %v1108_v56  ;;  %v4016_v41 = vpack.c.bf16 %v4007_v36, %v4005_v35  ;;  %v1215_v38 = vld [vmem:[#allocation2 + $0x30] sm:$0x1] }
 0x28c   : > { %v3483_v44 = vpop.eup %3482  ;;  %v1216_v42 = vsel %vm4026_vm8, 0, %v1215_v38 }
 0x28d   : > { %1273 = vrot.lane.b32.xlu0 %v4016_v41, %s3680_s17  ;;  %v4024_v43 = vpack.c.bf16 %v4012_v40, %v4010_v39  ;;  %v4042_v49 = vmul.f32 %v3483_v44, %v3992_v58  ;;  %1217 = vst [vmem:[#allocation2 + $0x30] sm:$0x1] %v1216_v42  ;;  %v1248_v44 = vsel %vm4033_vm9, 0, %v1247_v37 }
 0x28e   : > { %v3485_v46 = vpop.eup %3484  ;;  %1249 = vst [vmem:[#allocation2 + $0x34] sm:$0x1] %v1248_v44 }
 0x28f   : > { %1271 = vrot.lane.b32.xlu1 %v4024_v43, %s3680_s17  ;;  %v4048_v52 = vmul.f32 %v3485_v46, %v3995_v16  ;;  %v1198_v16 = vsel %vm4026_vm8, 0, %v1197_v15  ;;  %v3062_v46 = vld [vmem:[%s4680_s10] ss:$0 sm:$0xff] }
 0x290   : > { %v3487_v48 = vpop.eup %3486  ;;  %1199 = vst [vmem:[#allocation2] sm:$0x1] %v1198_v16 }
 0x291   : > { %v4045_v50 = vmul.f32 %v3487_v48, %v3998_v62  ;;  %v1233_v62 = vsel %vm4033_vm9, 0, %v1232_v25 }
 0x292   : > { %v3489_v51 = vpop.eup %3488  ;;  %1234 = vst [vmem:[#allocation2 + $0xc] sm:$0x1] %v1233_v62 }
 0x293   : > { %v4051_v9 = vmul.f32 %v3489_v51, %v4001_v2  ;;  %v4055_v4 = vpack.c.bf16 %v4045_v50, %v4042_v49  ;;  %v1242_v2 = vsel %vm4033_vm9, 0, %v1241_v0 }
 0x294   : > { %1243 = vst [vmem:[#allocation2 + $0x24] sm:$0x1] %v1242_v2 }
 0x295   : > { %1277 = vrot.lane.b32.xlu0 %v4055_v4, %s3680_s17  ;;  %v4061_v56 = vpack.c.bf16 %v4051_v9, %v4048_v52 }
 0x297   : > { %1275 = vrot.lane.b32.xlu1 %v4061_v56, %s3680_s17  ;;  %v4087_v10 = vld [vmem:[#allocation2] sm:$0xf] }
 0x298   : > { %v3075_v18 = vcombine.low %v4087_v10, %v1571_v17 }
 0x29a   : > { %v1627_v26 = vshrl.u32 %v3075_v18, 16  ;;  %v1629_v27 = vshll.u32 %v3075_v18, 16  ;;  %v1698_v45 = vrot.slane %v3075_v18, 1 }
 0x29c   : > { %v1631_v34 = vrot.slane %v1629_v27, 1 }
 0x29e   : > { %v1632_v30 = vor.u32 %v1631_v34, %v1627_v26 }
 0x2a0   : > { %1682 = vrot.lane.b32.xlu1 %v1632_v30, %s3681_s22 }
 0x2a4   : > { %1706 = vrot.lane.b32.xlu1 %v1698_v45, %s3683_s24 }
 0x2ff   : > { %v1274_v58 = vpop.permute.xlu0 %1273 }
 0x301   : > { %v1272_v57 = vpop.permute.xlu1 %1271 }
 0x302   : > { %3256 = vmatprep.mubr.msk.bf16.mxu0 %vm578_vm1, %v1272_v57 }
 0x303   : > { %3257 = vmatmul.mubr.msk.bf16.vlgmr.msra.gmra.mxu0 %vm578_vm1, %v1274_v58 }
 0x307   : > { %v1278_v60 = vpop.permute.xlu0 %1277 }
 0x309   : > { %v1276_v59 = vpop.permute.xlu1 %1275 }
 0x30a   : > { %3260 = vmatprep.mubr.msk.bf16.mxu0 %vm578_vm1, %v1276_v59 }
 0x30b   : > { %3261 = vmatmul.mubr.msk.bf16.gmra.mxu0 %vm578_vm1, %v1278_v60 }
 0x3c3   : > { %v3258_v47 = vpop.f32.mrf.mxu0 }
 0x3c4   : > { %v4111_v48 = vadd.f32 %v3258_v47, %v3062_v46 }
 0x3c5   : > { %v1328_v51 = vpop.f32.mrf.mxu0 }
 0x3c6   : > { %v1361_v53 = vsub.f32 0.0, %v4111_v48  ;;  %v4114_v55 = vadd.f32 %v3062_v46, %v1328_v51 }
 0x3c7   : > { %v3259_v20 = vpop.f32.mrf.mxu0 }
 0x3c8   : > { %v1371_v8 = vmul.f32 1.442695, %v1361_v53  ;;  %v1359_v3 = vsub.f32 0.0, %v4114_v55  ;;  %v4117_v57 = vadd.f32 %v3259_v20, %v3062_v46 }
 0x3c9   : > { %v1331_v58 = vpop.f32.mrf.mxu0 }
 0x3ca   : > { %3490 = vpow2.f32 %v1371_v8  ;;  %v1367_v59 = vmul.f32 1.442695, %v1359_v3  ;;  %v1362_v60 = vsub.f32 0.0, %v4117_v57  ;;  %v4120_v15 = vadd.f32 %v3062_v46, %v1331_v58 }
 0x3cb   : > { %v3262_v16 = vpop.f32.mrf.mxu0 }
 0x3cc   : > { %3492 = vpow2.f32 %v1367_v59  ;;  %v1373_v61 = vmul.f32 1.442695, %v1362_v60  ;;  %v1360_v25 = vsub.f32 0.0, %v4120_v15  ;;  %v4123_v28 = vadd.f32 %v3262_v16, %v3062_v46 }
 0x3cd   : > { %v1344_v62 = vpop.f32.mrf.mxu0 }
 0x3ce   : > { %3494 = vpow2.f32 %v1373_v61  ;;  %v1369_v63 = vmul.f32 1.442695, %v1360_v25  ;;  %v1365_v0 = vsub.f32 0.0, %v4123_v28  ;;  %v4126_v1 = vadd.f32 %v3062_v46, %v1344_v62 }
 0x3cf   : > { %v3263_v2 = vpop.f32.mrf.mxu0 }
 0x3d0   : > { %3496 = vpow2.f32 %v1369_v63  ;;  %v1379_v5 = vmul.f32 1.442695, %v1365_v0  ;;  %v1363_v54 = vsub.f32 0.0, %v4126_v1  ;;  %v4129_v6 = vadd.f32 %v3263_v2, %v3062_v46  ;;  %v1534_v2 = vld [vmem:[#allocation2 + $0x18] sm:$0xf] }
 0x3d1   : > { %v1347_v7 = vpop.f32.mrf.mxu0 }
 0x3d2   : > { %3498 = vpow2.f32 %v1379_v5  ;;  %v1375_v11 = vmul.f32 1.442695, %v1363_v54  ;;  %v1366_v12 = vsub.f32 0.0, %v4129_v6  ;;  %v4132_v13 = vadd.f32 %v3062_v46, %v1347_v7  ;;  %v1537_v5 = vld [vmem:[#allocation2 + $0x1c] sm:$0x1] }
 0x3d4   : > { %3500 = vpow2.f32 %v1375_v11  ;;  %v1381_v14 = vmul.f32 1.442695, %v1366_v12  ;;  %v1364_v17 = vsub.f32 0.0, %v4132_v13 }
 0x3d6   : > { %3502 = vpow2.f32 %v1381_v14  ;;  %v1377_v18 = vmul.f32 1.442695, %v1364_v17  ;;  %v1522_v17 = vld [vmem:[#allocation2 + $0x8] sm:$0xf] }
 0x3d7   : > { %v3491_v21 = vpop.eup %3490 }
 0x3d8   : > { %v1385_v24 = vadd.f32 1.0, %v3491_v21  ;;  %3504 = vpow2.f32 %v1377_v18  ;;  %v1525_v18 = vld [vmem:[#allocation2 + $0xc] sm:$0x1] }
 0x3d9   : > { %v3493_v26 = vpop.eup %3492 }
 0x3da   : > { %3506 = vrcp.f32 %v1385_v24  ;;  %v1383_v27 = vadd.f32 1.0, %v3493_v26 }
 0x3db   : > { %v3495_v29 = vpop.eup %3494 }
 0x3dc   : > { %3508 = vrcp.f32 %v1383_v27  ;;  %v1386_v31 = vadd.f32 1.0, %v3495_v29 }
 0x3dd   : > { %v3497_v32 = vpop.eup %3496 }
 0x3de   : > { %3510 = vrcp.f32 %v1386_v31  ;;  %v1384_v33 = vadd.f32 1.0, %v3497_v32 }
 0x3df   : > { %v3499_v34 = vpop.eup %3498 }
 0x3e0   : > { %3512 = vrcp.f32 %v1384_v33  ;;  %v1389_v38 = vadd.f32 1.0, %v3499_v34 }
 0x3e1   : > { %v3501_v42 = vpop.eup %3500 }
 0x3e2   : > { %3514 = vrcp.f32 %v1389_v38  ;;  %v1387_v37 = vadd.f32 1.0, %v3501_v42  ;;  %v1540_v42 = vld [vmem:[#allocation2 + $0x20] sm:$0xf] }
 0x3e3   : > { %v3503_v30 = vpop.eup %3502 }
 0x3e4   : > { %3516 = vrcp.f32 %v1387_v37  ;;  %v1390_v44 = vadd.f32 1.0, %v3503_v30  ;;  %v1543_v37 = vld [vmem:[#allocation2 + $0x24] sm:$0x1] }
 0x3e5   : > { %v3505_v45 = vpop.eup %3504 }
 0x3e6   : > { %3518 = vrcp.f32 %v1390_v44  ;;  %v1388_v46 = vadd.f32 1.0, %v3505_v45 }
 0x3e7   : > { %v3507_v47 = vpop.eup %3506 }
 0x3e8   : > { %v1401_v51 = vmul.f32 %v3507_v47, %v4111_v48  ;;  %3520 = vrcp.f32 %v1388_v46 }
 0x3e9   : > { %v3509_v53 = vpop.eup %3508 }
 0x3ea   : > { %v3154_v20 = vpack.c.bf16 %v1401_v51, %v1401_v51  ;;  %v1399_v8 = vmul.f32 %v3509_v53, %v4114_v55 }
 0x3eb   : > { %v3511_v3 = vpop.eup %3510 }
 0x3ec   : > { %v1456_v58 = vshrl.u32 %v3154_v20, 16  ;;  %v3152_v59 = vpack.c.bf16 %v1399_v8, %v1399_v8  ;;  %v1402_v60 = vmul.f32 %v3511_v3, %v4117_v57  ;;  %v1459_v25 = vshll.u32 %v3154_v20, 16  ;;  %v1528_v20 = vld [vmem:[#allocation2 + $0x10] sm:$0xf]  ;;  %v1531_v8 = vld [vmem:[#allocation2 + $0x14] sm:$0x1] }
 0x3ed   : > { %v3513_v16 = vpop.eup %3512 }
 0x3ee   : > { %v1458_v61 = vrot.slane %v1456_v58, 7  ;;  %v1440_v62 = vshrl.u32 %v3152_v59, 16  ;;  %v3155_v63 = vpack.c.bf16 %v1402_v60, %v1402_v60  ;;  %v1443_v55 = vshll.u32 %v3152_v59, 16 }
 0x3ef   : > { %v3515_v0 = vpop.eup %3514  ;;  %v1400_v54 = vmul.f32 %v3513_v16, %v4120_v15 }
 0x3f0   : > { %v1461_v7 = vor.u32 %v1459_v25, %v1458_v61  ;;  %v1462_v11 = vrot.slane %v1458_v61, 4  ;;  %v1442_v57 = vrot.slane %v1440_v62, 7  ;;  %v1464_v12 = vshrl.u32 %v3155_v63, 16  ;;  %v1558_v25 = vld [vmem:[#allocation2 + $0x38] sm:$0xf] }
 0x3f1   : > { %v3517_v14 = vpop.eup %3516  ;;  %v1467_v19 = vshll.u32 %v3155_v63, 16  ;;  %v3153_v21 = vpack.c.bf16 %v1400_v54, %v1400_v54  ;;  %v1405_v22 = vmul.f32 %v3515_v0, %v4123_v28  ;;  %v1561_v63 = vld [vmem:[#allocation2 + $0x3c] sm:$0x1]  ;;  %v1546_v54 = vld [vmem:[#allocation2 + $0x28] sm:$0xf] }
 0x3f2   : > { %v1535_v24 = vsel %vm4142_vm10, %v1461_v7, %v1534_v2  ;;  %v1538_v26 = vsel %vm4026_vm8, %v1462_v11, %v1537_v5  ;;  %v1445_v27 = vor.u32 %v1443_v55, %v1442_v57  ;;  %v1446_v29 = vrot.slane %v1442_v57, 4  ;;  %v1549_v7 = vld [vmem:[#allocation2 + $0x2c] sm:$0x1] }
 0x3f3   : > { %v3519_v15 = vpop.eup %3518  ;;  %1536 = vst [vmem:[#allocation2 + $0x18] sm:$0xf] %v1535_v24  ;;  %1539 = vst [vmem:[#allocation2 + $0x1c] sm:$0x1] %v1538_v26  ;;  %v1466_v31 = vrot.slane %v1464_v12, 7  ;;  %v1448_v32 = vshrl.u32 %v3153_v21, 16  ;;  %v3158_v34 = vpack.c.bf16 %v1405_v22, %v1405_v22  ;;  %v1403_v30 = vmul.f32 %v3517_v14, %v4126_v1 }
 0x3f4   : > { %v1451_v33 = vshll.u32 %v3153_v21, 16  ;;  %v1523_v38 = vsel %vm4142_vm10, %v1445_v27, %v1522_v17  ;;  %v1526_v28 = vsel %vm4026_vm8, %v1446_v29, %v1525_v18  ;;  %v1406_v44 = vmul.f32 %v3519_v15, %v4129_v6  ;;  %v1567_v21 = vld [vmem:[#allocation2 + $0x44] sm:$0x1] }
 0x3f5   : > { %v3521_v45 = vpop.eup %3520  ;;  %1524 = vst [vmem:[#allocation2 + $0x8] sm:$0xf] %v1523_v38  ;;  %1527 = vst [vmem:[#allocation2 + $0xc] sm:$0x1] %v1526_v28  ;;  %v1469_v46 = vor.u32 %v1467_v19, %v1466_v31  ;;  %v1470_v47 = vrot.slane %v1466_v31, 4  ;;  %v1450_v51 = vrot.slane %v1448_v32, 7  ;;  %v3156_v58 = vpack.c.bf16 %v1403_v30, %v1403_v30 }
 0x3f6   : > { %v1488_v53 = vshrl.u32 %v3158_v34, 16  ;;  %v1491_v3 = vshll.u32 %v3158_v34, 16  ;;  %v3159_v59 = vpack.c.bf16 %v1406_v44, %v1406_v44  ;;  %v1404_v60 = vmul.f32 %v3521_v45, %v4132_v13  ;;  %v1564_v19 = vld [vmem:[#allocation2 + $0x40] sm:$0xf] }
 0x3f7   : > { %v1541_v16 = vsel %vm4142_vm10, %v1469_v46, %v1540_v42  ;;  %v1544_v1 = vsel %vm4026_vm8, %v1470_v47, %v1543_v37  ;;  %v1453_v6 = vor.u32 %v1451_v33, %v1450_v51  ;;  %v1454_v61 = vrot.slane %v1450_v51, 4  ;;  %v1552_v51 = vld [vmem:[#allocation2 + $0x30] sm:$0xf] }
 0x3f8   : > { %1542 = vst [vmem:[#allocation2 + $0x20] sm:$0xf] %v1541_v16  ;;  %1545 = vst [vmem:[#allocation2 + $0x24] sm:$0x1] %v1544_v1  ;;  %v1490_v62 = vrot.slane %v1488_v53, 7  ;;  %v1472_v0 = vshrl.u32 %v3156_v58, 16  ;;  %v3157_v57 = vpack.c.bf16 %v1404_v60, %v1404_v60 }
 0x3f9   : > { %v1475_v2 = vshll.u32 %v3156_v58, 16  ;;  %v1496_v5 = vshrl.u32 %v3159_v59, 16  ;;  %v1529_v55 = vsel %vm4142_vm10, %v1453_v6, %v1528_v20  ;;  %v1532_v13 = vsel %vm4026_vm8, %v1454_v61, %v1531_v8  ;;  %v1555_v53 = vld [vmem:[#allocation2 + $0x34] sm:$0x1] }
 0x3fa   : > { %v1499_v11 = vshll.u32 %v3159_v59, 16  ;;  %1530 = vst [vmem:[#allocation2 + $0x10] sm:$0xf] %v1529_v55  ;;  %1533 = vst [vmem:[#allocation2 + $0x14] sm:$0x1] %v1532_v13  ;;  %v1493_v12 = vor.u32 %v1491_v3, %v1490_v62  ;;  %v1494_v14 = vrot.slane %v1490_v62, 4 }
 0x3fb   : > { %v1474_v17 = vrot.slane %v1472_v0, 7  ;;  %v1498_v18 = vrot.slane %v1496_v5, 7  ;;  %v4167_v22 = vld [vmem:[#allocation2 + $0x18] sm:$0xf]  ;;  %v1480_v24 = vshrl.u32 %v3157_v57, 16  ;;  %v1483_v26 = vshll.u32 %v3157_v57, 16 }
 0x3fc   : > { %v1577_v27 = vld [vmem:[#allocation2 + $0x1c] sm:$0x1]  ;;  %v4169_v29 = vld [vmem:[#allocation2 + $0x18] sm:$0xf]  ;;  %v1559_v15 = vsel %vm4142_vm10, %v1493_v12, %v1558_v25  ;;  %v1562_v31 = vsel %vm4026_vm8, %v1494_v14, %v1561_v63  ;;  %v4180_v45 = vld [vmem:[#allocation2 + $0x8] sm:$0xf] }
 0x3fd   : > { %v1477_v32 = vor.u32 %v1475_v2, %v1474_v17  ;;  %v1478_v33 = vrot.slane %v1474_v17, 4  ;;  %v1771_v34 = vld [vmem:[#allocation2 + $0x1c] sm:$0x1]  ;;  %v4175_v38 = vld [vmem:[#allocation2 + $0x18] sm:$0xf]  ;;  %v1501_v28 = vor.u32 %v1499_v11, %v1498_v18  ;;  %v1502_v42 = vrot.slane %v1498_v18, 4 }
 0x3fe   : > { %1560 = vst [vmem:[#allocation2 + $0x38] sm:$0xf] %v1559_v15  ;;  %1563 = vst [vmem:[#allocation2 + $0x3c] sm:$0x1] %v1562_v31  ;;  %v1482_v37 = vrot.slane %v1480_v24, 7  ;;  %v4178_v30 = vcombine.low %v4167_v22, %v1577_v27  ;;  %v3085_v20 = vcombine.low %v4169_v29, %v1771_v34 }
 0x3ff   : > { %v2185_v44 = vld [vmem:[#allocation2 + $0x1c] sm:$0x1]  ;;  %v1547_v46 = vsel %vm4142_vm10, %v1477_v32, %v1546_v54  ;;  %v1550_v47 = vsel %vm4026_vm8, %v1478_v33, %v1549_v7  ;;  %v1767_v8 = vld [vmem:[#allocation2 + $0xc] sm:$0x1]  ;;  %v1565_v3 = vsel %vm4142_vm10, %v1501_v28, %v1564_v19  ;;  %v1568_v58 = vsel %vm4026_vm8, %v1502_v42, %v1567_v21  ;;  %v4198_v63 = vld [vmem:[#allocation2 + $0x8] sm:$0xf] }
 0x400   : > { %1548 = vst [vmem:[#allocation2 + $0x28] sm:$0xf] %v1547_v46  ;;  %1551 = vst [vmem:[#allocation2 + $0x2c] sm:$0x1] %v1550_v47  ;;  %v1485_v59 = vor.u32 %v1483_v26, %v1482_v37  ;;  %v1486_v60 = vrot.slane %v1482_v37, 4  ;;  %v1701_v16 = vrot.slane %v4178_v30, 1  ;;  %v3115_v6 = vcombine.low %v4175_v38, %v2185_v44 }
 0x401   : > { %1566 = vst [vmem:[#allocation2 + $0x40] sm:$0xf] %v1565_v3  ;;  %1569 = vst [vmem:[#allocation2 + $0x44] sm:$0x1] %v1568_v58  ;;  %v1896_v1 = vrot.slane %v3085_v20, 1  ;;  %v3083_v61 = vcombine.low %v4180_v45, %v1767_v8  ;;  %v1839_v2 = vshll.u32 %v3085_v20, 16 }
 0x402   : > { %v1553_v25 = vsel %vm4142_vm10, %v1485_v59, %v1552_v51  ;;  %v1556_v62 = vsel %vm4026_vm8, %v1486_v60, %v1555_v53  ;;  %v1573_v0 = vld [vmem:[#allocation2 + $0xc] sm:$0x1]  ;;  %1712 = vrot.lane.b32.xlu0 %v1701_v16, %s3683_s24  ;;  %v4202_v5 = vld [vmem:[#allocation2 + $0x20] sm:$0xf]  ;;  %v2311_v55 = vrot.slane %v3115_v6, 1  ;;  %v1837_v57 = vshrl.u32 %v3085_v20, 16 }
 0x403   : > { %1554 = vst [vmem:[#allocation2 + $0x30] sm:$0xf] %v1553_v25  ;;  %1557 = vst [vmem:[#allocation2 + $0x34] sm:$0x1] %v1556_v62  ;;  %1906 = vrot.lane.b32.xlu1 %v1896_v1, %s3683_s24  ;;  %v1894_v13 = vrot.slane %v3083_v61, 1  ;;  %v3076_v48 = vcombine.low %v4198_v63, %v1573_v0  ;;  %v1841_v54 = vrot.slane %v1839_v2, 1 }
 0x404   : > { %v1773_v7 = vld [vmem:[#allocation2 + $0x24] sm:$0x1]  ;;  %v4205_v23 = vld [vmem:[#allocation2 + $0x20] sm:$0xf]  ;;  %v1650_v19 = vshll.u32 %v4178_v30, 16  ;;  %v2248_v32 = vshll.u32 %v3115_v6, 16 }
 0x405   : > { %v2187_v11 = vld [vmem:[#allocation2 + $0x24] sm:$0x1]  ;;  %v4210_v12 = vcombine.low %v4202_v5, %v1773_v7  ;;  %v1699_v14 = vrot.slane %v3076_v48, 1  ;;  %v1842_v17 = vor.u32 %v1841_v54, %v1837_v57  ;;  %v4216_v21 = vld [vmem:[#allocation2 + $0x20] sm:$0xf]  ;;  %v1825_v33 = vshll.u32 %v3083_v61, 16 }
 0x406   : > { %2320 = vrot.lane.b32.xlu0 %v2311_v55, %s3683_s24  ;;  %v4213_v18 = vcombine.low %v4205_v23, %v2187_v11  ;;  %v1579_v24 = vld [vmem:[#allocation2 + $0x24] sm:$0x1]  ;;  %v1652_v31 = vrot.slane %v1650_v19, 1  ;;  %v1648_v34 = vshrl.u32 %v4178_v30, 16  ;;  %v4228_v28 = vld [vmem:[#allocation2 + $0x10] sm:$0xf] }
 0x407   : > { %1902 = vrot.lane.b32.xlu1 %v1894_v13, %s3683_s24  ;;  %v1897_v26 = vrot.slane %v4210_v12, 1  ;;  %v4222_v27 = vcombine.low %v4216_v21, %v1579_v24  ;;  %v1769_v42 = vld [vmem:[#allocation2 + $0x14] sm:$0x1]  ;;  %v4230_v37 = vld [vmem:[#allocation2 + $0x10] sm:$0xf]  ;;  %v2250_v47 = vrot.slane %v2248_v32, 1 }
 0x408   : > { %v2312_v15 = vrot.slane %v4213_v18, 1  ;;  %v1653_v44 = vor.u32 %v1652_v31, %v1648_v34  ;;  %v1827_v51 = vrot.slane %v1825_v33, 1  ;;  %v1575_v53 = vld [vmem:[#allocation2 + $0x14] sm:$0x1]  ;;  %v2246_v20 = vshrl.u32 %v3115_v6, 16  ;;  %v3420_v24 = vld [vmem:[%s4681_s11 + $0xc] sm:$0xff]  }
 0x409   : > { %v1702_v46 = vrot.slane %v4222_v27, 1  ;;  %v1823_v8 = vshrl.u32 %v3083_v61, 16  ;;  %v3084_v3 = vcombine.low %v4228_v28, %v1769_v42  ;;  %v4237_v30 = vcombine.low %v4230_v37, %v1575_v53  ;;  %v4239_v16 = vld [vmem:[#allocation2 + $0x10] sm:$0xf]  ;;  %v2183_v1 = vld [vmem:[#allocation2 + $0x14] sm:$0x1] }
 0x40a   : > { %1708 = vrot.lane.b32.xlu0 %v1699_v14, %s3683_s24  ;;  %v2251_v58 = vor.u32 %v2250_v47, %v2246_v20  ;;  %v1636_v60 = vshll.u32 %v3076_v48, 16  ;;  %v4245_v6 = vcombine.low %v4239_v16, %v2183_v1  ;;  %v4247_v61 = vld [vmem:[#allocation2 + $0x38] sm:$0xf]  ;;  %v1846_v2 = vshll.u32 %v4210_v12, 16  ;;  %v1779_v55 = vld [vmem:[#allocation2 + $0x3c] sm:$0x1] }
 0x40b   : > { %1882 = vrot.lane.b32.xlu1 %v1842_v17, %s3681_s22  ;;  %v1828_v59 = vor.u32 %v1827_v51, %v1823_v8  ;;  %v1895_v25 = vrot.slane %v3084_v3, 1  ;;  %v1700_v62 = vrot.slane %v4237_v30, 1  ;;  %v3419_v13 = vld [vmem:[%s4681_s11 + $0x14] ss:$0 sps:$4 sm:$0xff]   ;;  %v1634_v54 = vshrl.u32 %v3076_v48, 16 }
 0x40c   : > { %v1638_v0 = vrot.slane %v1636_v60, 1  ;;  %v2310_v7 = vrot.slane %v4245_v6, 1  ;;  %v4257_v11 = vcombine.low %v4247_v61, %v1779_v55  ;;  %3325 = vmatprep.subr.msk.bf16.mxu1 %vm1066_vm3, %v3419_v13  ;;  %v1848_v14 = vrot.slane %v1846_v2, 1  ;;  %v3421_v42 = vld [vmem:[%s4681_s11 + $0x8] ss:$0 sps:$4 sm:$0xff]   ;;  %v3422_v55 = vld [vmem:[%s4681_s11] sm:$0xff]  }
 0x40d   : > { %v1832_v17 = vshll.u32 %v3084_v3, 16  ;;  %v2255_v19 = vshll.u32 %v4213_v18, 16  ;;  %v1844_v48 = vshrl.u32 %v4210_v12, 16  ;;  %v1657_v34 = vshll.u32 %v4222_v27, 16  ;;  %v4279_v53 = vld [vmem:[#allocation2 + $0x28] sm:$0xf]  ;;  %3326 = vmatprep.subr.msk.bf16.mxu0 %vm1066_vm3, %v3421_v42 }
 0x40e   : > { %1908 = vrot.lane.b32.xlu0 %v1897_v26, %s3683_s24  ;;  %v1639_v57 = vor.u32 %v1638_v0, %v1634_v54  ;;  %v1900_v26 = vrot.slane %v4257_v11, 1  ;;  %v1830_v12 = vshrl.u32 %v3084_v3, 16  ;;  %v2253_v47 = vshrl.u32 %v4213_v18, 16  ;;  %v1775_v20 = vld [vmem:[#allocation2 + $0x2c] sm:$0x1] }
 0x40f   : > { %2322 = vrot.lane.b32.xlu1 %v2312_v15, %s3683_s24  ;;  %v2005_v15 = vsel %vm1066_vm3, %v3419_v13, 0  ;;  %v1849_v31 = vor.u32 %v1848_v14, %v1844_v48  ;;  %v1834_v32 = vrot.slane %v1832_v17, 1  ;;  %v2257_v33 = vrot.slane %v2255_v19, 1  ;;  %v4285_v1 = vld [vmem:[#allocation2 + $0x28] sm:$0xf] }
 0x410   : > { %3265 = vmatpush3.bf16.msra.mxu1 %v2005_v15  ;;  %v2114_v51 = vsel %vm1066_vm3, %v3421_v42, 0  ;;  %v4287_v3 = vld [vmem:[#allocation2 + $0x38] sm:$0xf]  ;;  %v1585_v18 = vld [vmem:[#allocation2 + $0x3c] sm:$0x1]  ;;  %v3087_v0 = vcombine.low %v4279_v53, %v1775_v20 }
 0x411   : > { %3266 = vmatprep.subr.bf16.mxu1 %v3420_v24  ;;  %v1835_v8 = vor.u32 %v1834_v32, %v1830_v12  ;;  %3277 = vmatpush3.bf16.msra.mxu0 %v2114_v51  ;;  %v1781_v14 = vld [vmem:[#allocation2 + $0x44] sm:$0x1]  ;;  %v4304_v17 = vcombine.low %v4287_v3, %v1585_v18  ;;  %v1867_v12 = vshll.u32 %v4257_v11, 16  ;;  %v2239_v51 = vshrl.u32 %v4245_v6, 16 }
 0x412   : > { %1688 = vrot.lane.b32.xlu0 %v1653_v44, %s3681_s22  ;;  %v4273_v44 = vld [vmem:[#allocation2 + $0x28] sm:$0xf]  ;;  %3278 = vmatprep.subr.bf16.mxu0 %v3422_v55 }
 0x413   : > { %1714 = vrot.lane.b32.xlu1 %v1702_v46, %s3683_s24  ;;  %v2189_v46 = vld [vmem:[#allocation2 + $0x2c] sm:$0x1]  ;;  %v1678_v15 = vshll.u32 %v4304_v17, 16  ;;  %v1676_v20 = vshrl.u32 %v4304_v17, 16 }
 0x414   : > { %v4283_v60 = vcombine.low %v4273_v44, %v2189_v46  ;;  %3267 = vmatpush3.bf16.msra.mxu1 %v3420_v24 }
 0x415   : > { %3279 = vmatpush3.bf16.msra.mxu0 %v3422_v55  ;;  %v1680_v46 = vrot.slane %v1678_v15, 1  ;;  %v2195_v55 = vld [vmem:[#allocation2 + $0x44] sm:$0x1]  ;;  %v1851_v15 = vshrl.u32 %v3087_v0, 16 }
 0x416   : > { %2296 = vrot.lane.b32.xlu0 %v2251_v58, %s3681_s22  ;;  %v2258_v58 = vor.u32 %v2257_v33, %v2253_v47  ;;  %v2313_v54 = vrot.slane %v4283_v60, 1  ;;  %v4318_v33 = vld [vmem:[#allocation2 + $0x30] sm:$0xf]  ;;  %v1777_v47 = vld [vmem:[#allocation2 + $0x34] sm:$0x1]  ;;  %v2262_v18 = vshll.u32 %v4283_v60, 16 }
 0x417   : > { %1878 = vrot.lane.b32.xlu1 %v1828_v59, %s3681_s22  ;;  %v1659_v59 = vrot.slane %v1657_v34, 1 }
 0x41a   : > { %1904 = vrot.lane.b32.xlu0 %v1895_v25, %s3683_s24  ;;  %v1581_v25 = vld [vmem:[#allocation2 + $0x2c] sm:$0x1] }
 0x41b   : > { %1710 = vrot.lane.b32.xlu1 %v1700_v62, %s3683_s24  ;;  %v1655_v62 = vshrl.u32 %v4222_v27, 16  ;;  %v4294_v2 = vcombine.low %v4285_v1, %v1581_v25  ;;  %v1898_v27 = vrot.slane %v3087_v0, 1  ;;  %v1869_v25 = vrot.slane %v1867_v12, 1 }
 0x41d   : > { %v1660_v13 = vor.u32 %v1659_v59, %v1655_v62  ;;  %v1703_v24 = vrot.slane %v4294_v2, 1  ;;  %v1681_v59 = vor.u32 %v1680_v46, %v1676_v20  ;;  %v4327_v62 = vld [vmem:[#allocation2 + $0x40] sm:$0xf] }
 0x41e   : > { %1684 = vrot.lane.b32.xlu0 %v1639_v57, %s3681_s22  ;;  %v4301_v57 = vld [vmem:[#allocation2 + $0x40] sm:$0xf] }
 0x41f   : > { %2318 = vrot.lane.b32.xlu1 %v2310_v7, %s3683_s24  ;;  %v1643_v7 = vshll.u32 %v4237_v30, 16  ;;  %v4309_v19 = vcombine.low %v4301_v57, %v1781_v14  ;;  %v2264_v14 = vrot.slane %v2262_v18, 1  ;;  %v4356_v18 = vld [vmem:[#allocation2 + $0x38] sm:$0xf] }
 0x421   : > { %v1645_v48 = vrot.slane %v1643_v7, 1  ;;  %v1901_v32 = vrot.slane %v4309_v19, 1 }
 0x422   : > { %1884 = vrot.lane.b32.xlu0 %v1849_v31, %s3681_s22  ;;  %v1641_v31 = vshrl.u32 %v4237_v30, 16  ;;  %v3088_v30 = vcombine.low %v4318_v33, %v1777_v47 }
 0x423   : > { %1914 = vrot.lane.b32.xlu1 %v1900_v26, %s3683_s24  ;;  %v2241_v26 = vshll.u32 %v4245_v6, 16 }
 0x424   : > { %v1646_v34 = vor.u32 %v1645_v48, %v1641_v31  ;;  %v1899_v6 = vrot.slane %v3088_v30, 1  ;;  %v1664_v48 = vshll.u32 %v4294_v2, 16  ;;  %v2260_v31 = vshrl.u32 %v4283_v60, 16 }
 0x425   : > { %v2243_v42 = vrot.slane %v2241_v26, 1  ;;  %v4336_v26 = vcombine.low %v4327_v62, %v2195_v55  ;;  %v1662_v60 = vshrl.u32 %v4294_v2, 16  ;;  %v2193_v55 = vld [vmem:[#allocation2 + $0x3c] sm:$0x1] }
 0x426   : > { %1880 = vrot.lane.b32.xlu0 %v1835_v8, %s3681_s22  ;;  %v1853_v8 = vshll.u32 %v3087_v0, 16  ;;  %v1666_v46 = vrot.slane %v1664_v48, 1  ;;  %v1874_v0 = vshll.u32 %v4309_v19, 16 }
 0x427   : > { %2298 = vrot.lane.b32.xlu1 %v2258_v58, %s3681_s22  ;;  %v2244_v58 = vor.u32 %v2243_v42, %v2239_v51  ;;  %v2265_v42 = vor.u32 %v2264_v14, %v2260_v31  ;;  %v2283_v12 = vshll.u32 %v4336_v26, 16  ;;  %v4354_v51 = vld [vmem:[#allocation2 + $0x30] sm:$0xf]  ;;  %v2197_v14 = vld [vmem:[#allocation2 + $0x4c] sm:$0x1]  ;;  %v3119_v31 = vcombine.low %v4356_v18, %v2193_v55 }
 0x428   : > { %v1667_v20 = vor.u32 %v1666_v46, %v1662_v60 }
 0x429   : > { %v2276_v60 = vshll.u32 %v3119_v31, 16  ;;  %v2274_v55 = vshrl.u32 %v3119_v31, 16 }
 0x42a   : > { %2324 = vrot.lane.b32.xlu0 %v2313_v54, %s3683_s24  ;;  %v1855_v54 = vrot.slane %v1853_v8, 1  ;;  %v2285_v8 = vrot.slane %v2283_v12, 1 }
 0x42b   : > { %1690 = vrot.lane.b32.xlu1 %v1660_v13, %s3681_s22  ;;  %v1865_v13 = vshrl.u32 %v4257_v11, 16 }
 0x42c   : > { %v1856_v11 = vor.u32 %v1855_v54, %v1851_v15 }
 0x42d   : > { %v1870_v7 = vor.u32 %v1869_v25, %v1865_v13  ;;  %v1860_v25 = vshll.u32 %v3088_v30, 16  ;;  %v2281_v13 = vshrl.u32 %v4336_v26, 16 }
 0x42e   : > { %1716 = vrot.lane.b32.xlu0 %v1703_v24, %s3683_s24  ;;  %v1583_v24 = vld [vmem:[#allocation2 + $0x34] sm:$0x1] }
 0x42f   : > { %1910 = vrot.lane.b32.xlu1 %v1898_v27, %s3683_s24  ;;  %v4332_v27 = vld [vmem:[#allocation2 + $0x30] sm:$0xf]  ;;  %v1862_v15 = vrot.slane %v1860_v25, 1  ;;  %v2278_v25 = vrot.slane %v2276_v60, 1 }
 0x432   : > { %1916 = vrot.lane.b32.xlu0 %v1901_v32, %s3683_s24  ;;  %v3081_v32 = vcombine.low %v4332_v27, %v1583_v24  ;;  %v2286_v24 = vor.u32 %v2285_v8, %v2281_v13 }
 0x433   : > { %1686 = vrot.lane.b32.xlu1 %v1646_v34, %s3681_s22  ;;  %v4345_v34 = vld [vmem:[%s4681_s11 + $0x20] ss:$0 sps:$4 sm:$0xff]  }
 0x434   : > { %3327 = vmatprep.subr.msk.bf16.mxu1 %vm1066_vm3, %v4345_v34  ;;  %v1704_v47 = vrot.slane %v3081_v32, 1  ;;  %v1671_v54 = vshll.u32 %v3081_v32, 16 }
 0x436   : > { %1696 = vrot.lane.b32.xlu0 %v1681_v59, %s3681_s22  ;;  %v2191_v59 = vld [vmem:[#allocation2 + $0x34] sm:$0x1]  ;;  %v1673_v12 = vrot.slane %v1671_v54, 1 }
 0x437   : > { %2294 = vrot.lane.b32.xlu1 %v2244_v58, %s3681_s22  ;;  %v1876_v58 = vrot.slane %v1874_v0, 1  ;;  %v3118_v2 = vcombine.low %v4354_v51, %v2191_v59 }
 0x439   : > { %v2314_v46 = vrot.slane %v3118_v2, 1  ;;  %v2269_v0 = vshll.u32 %v3118_v2, 16 }
 0x43a   : > { %1912 = vrot.lane.b32.xlu0 %v1899_v6, %s3683_s24  ;;  %v1872_v6 = vshrl.u32 %v4309_v19, 16 }
 0x43b   : > { %1890 = vrot.lane.b32.xlu1 %v1870_v7, %s3681_s22  ;;  %v4363_v7 = vld [vmem:[#allocation2 + $0x48] sm:$0xf]  ;;  %v2271_v59 = vrot.slane %v2269_v0, 1 }
 0x43c   : > { %v1877_v48 = vor.u32 %v1876_v58, %v1872_v6  ;;  %v1705_v58 = vrot.slane %v4304_v17, 1  ;;  %v2315_v17 = vrot.slane %v3119_v31, 1 }
 0x43e   : > { %2300 = vrot.lane.b32.xlu0 %v2265_v42, %s3681_s22  ;;  %v3121_v42 = vcombine.low %v4363_v7, %v2197_v14  ;;  %v2279_v14 = vor.u32 %v2278_v25, %v2274_v55 }
 0x43f   : > { %1886 = vrot.lane.b32.xlu1 %v1856_v11, %s3681_s22  ;;  %v1858_v11 = vshrl.u32 %v3088_v30, 16  ;;  %v2267_v30 = vshrl.u32 %v3118_v2, 16 }
 0x440   : > { %v2288_v13 = vshrl.u32 %v3121_v42, 16  ;;  %v2317_v2 = vrot.slane %v3121_v42, 1 }
 0x441   : > { %v1863_v19 = vor.u32 %v1862_v15, %v1858_v11  ;;  %v2272_v54 = vor.u32 %v2271_v59, %v2267_v30 }
 0x442   : > { %1692 = vrot.lane.b32.xlu0 %v1667_v20, %s3681_s22  ;;  %v2290_v20 = vshll.u32 %v3121_v42, 16 }
 0x443   : > { %1718 = vrot.lane.b32.xlu1 %v1704_v47, %s3683_s24  ;;  %v1669_v47 = vshrl.u32 %v3081_v32, 16 }
 0x444   : > { %v2292_v6 = vrot.slane %v2290_v20, 1 }
 0x445   : > { %v1674_v8 = vor.u32 %v1673_v12, %v1669_v47 }
 0x446   : > { %1892 = vrot.lane.b32.xlu0 %v1877_v48, %s3681_s22  ;;  %v2293_v32 = vor.u32 %v2292_v6, %v2288_v13  ;;  %v1683_v48 = vpop.permute.xlu1 %1682 }
 0x447   : > { %2306 = vrot.lane.b32.xlu1 %v2286_v24, %s3681_s22  ;;  %v2316_v24 = vrot.slane %v4336_v26, 1  ;;  %v1724_v25 = vsel %vm578_vm1, %v4087_v10, %v1683_v48 }
 0x44a   : > { %1888 = vrot.lane.b32.xlu0 %v1863_v19, %s3681_s22  ;;  %v1707_v15 = vpop.permute.xlu1 %1706 }
 0x44b   : > { %2326 = vrot.lane.b32.xlu1 %v2314_v46, %s3683_s24  ;;  %v1748_v6 = vsel %vm1746_vm11, %v1724_v25, %v1707_v15 }
 0x44e   : > { %1720 = vrot.lane.b32.xlu0 %v1705_v58, %s3683_s24 }
 0x44f   : > { %1694 = vrot.lane.b32.xlu1 %v1674_v8, %s3681_s22 }
 0x452   : > { %2304 = vrot.lane.b32.xlu0 %v2279_v14, %s3681_s22 }
 0x453   : > { %2302 = vrot.lane.b32.xlu1 %v2272_v54, %s3681_s22 }
 0x456   : > { %2308 = vrot.lane.b32.xlu0 %v2293_v32, %s3681_s22 }
 0x457   : > { %2330 = vrot.lane.b32.xlu1 %v2316_v24, %s3683_s24 }
 0x45a   : > { %2328 = vrot.lane.b32.xlu0 %v2315_v17, %s3683_s24 }
 0x45e   : > { %2332 = vrot.lane.b32.xlu0 %v2317_v2, %s3683_s24 }
 0x474   : > { %v1713_v11 = vpop.permute.xlu0 %1712 }
 0x475   : > { %v1907_v46 = vpop.permute.xlu1 %1906 }
 0x478   : > { %v4381_v19 = vpop.permute.xlu0 %2320 }
 0x479   : > { %v1903_v12 = vpop.permute.xlu1 %1902 }
 0x47c   : > { %v1709_v0 = vpop.permute.xlu0 %1708 }
 0x47d   : > { %v1883_v60 = vpop.permute.xlu1 %1882 }
 0x47e   : > { %v1926_v2 = vsel %vm578_vm1, %v4169_v29, %v1883_v60  ;;  %v2420_v29 = vsel %vm1066_vm3, %v4345_v34, 0  ;;  %v3424_v60 = vld [vmem:[%s4681_s11 + $0x18] sm:$0xff]  }
 0x480   : > { %v1909_v26 = vpop.permute.xlu0 %1908 }
 0x481   : > { %v4383_v47 = vpop.permute.xlu1 %2322 }
 0x484   : > { %v1689_v20 = vpop.permute.xlu0 %1688 }
 0x485   : > { %v1715_v8 = vpop.permute.xlu1 %1714 }
 0x488   : > { %v4385_v31 = vpop.permute.xlu0 %2296 }
 0x489   : > { %v1879_v58 = vpop.permute.xlu1 %1878 }
 0x48a   : > { %v1920_v17 = vsel %vm578_vm1, %v4180_v45, %v1879_v58 }
 0x48b   : > { %v1943_v25 = vsel %vm1746_vm11, %v1920_v17, %v1903_v12 }
 0x48c   : > { %v1905_v42 = vpop.permute.xlu0 %1904 }
 0x48d   : > { %v1711_v59 = vpop.permute.xlu1 %1710 }
 0x490   : > { %v1685_v30 = vpop.permute.xlu0 %1684 }
 0x491   : > { %v4389_v55 = vpop.permute.xlu1 %2318  ;;  %v1727_v13 = vsel %vm578_vm1, %v4198_v63, %v1685_v30 }
 0x492   : > { %v1750_v54 = vsel %vm1746_vm11, %v1727_v13, %v1709_v0 }
 0x493   : > { %v3104_v14 = vcombine.low %v1748_v6, %v1750_v54 }
 0x494   : > { %v1885_v32 = vpop.permute.xlu0 %1884 }
 0x495   : > { %v1915_v24 = vpop.permute.xlu1 %1914  ;;  %3280 = vmatprep.mubr.msk.bf16.mxu0 %vm1991_vm12, %v3104_v14  ;;  %v1929_v10 = vsel %vm578_vm1, %v4202_v5, %v1885_v32  ;;  %v1947_v5 = vsel %vm1746_vm11, %v1926_v2, %v1907_v46  ;;  %v1733_v46 = vsel %vm578_vm1, %v4167_v22, %v1689_v20 }
 0x496   : > { %v1949_v15 = vsel %vm1746_vm11, %v1929_v10, %v1909_v26  ;;  %v1754_v54 = vsel %vm1746_vm11, %v1733_v46, %v1713_v11 }
 0x497   : > { %v3095_v6 = vcombine.low %v1947_v5, %v1949_v15 }
 0x498   : > { %v1881_v63 = vpop.permute.xlu0 %1880 }
 0x499   : > { %v4402_v48 = vpop.permute.xlu1 %2298  ;;  %v1923_v0 = vsel %vm578_vm1, %v4228_v28, %v1881_v63 }
 0x49a   : > { %v1945_v30 = vsel %vm1746_vm11, %v1923_v0, %v1905_v42 }
 0x49b   : > { %v3094_v13 = vcombine.low %v1943_v25, %v1945_v30 }
 0x49c   : > { %v4410_v45 = vpop.permute.xlu0 %2324 }
 0x49d   : > { %v1691_v58 = vpop.permute.xlu1 %1690  ;;  %3268 = vmatprep.mubr.msk.bf16.mxu1 %vm1991_vm12, %v3094_v13 }
 0x49e   : > { %3269 = vmatmul.mubr.msk.bf16.vlgmr.msra.gmra.mxu1 %vm1991_vm12, %v3095_v6  ;;  %v1736_v22 = vsel %vm578_vm1, %v4216_v21, %v1691_v58 }
 0x49f   : > { %3289 = vmatpush3.bf16.msra.mxu1 %v2420_v29  ;;  %v1756_v11 = vsel %vm1746_vm11, %v1736_v22, %v1715_v8 }
 0x4a0   : > { %v1717_v28 = vpop.permute.xlu0 %1716  ;;  %3290 = vmatprep.subr.bf16.mxu1 %v3424_v60 }
 0x4a1   : > { %v1911_v12 = vpop.permute.xlu1 %1910 }
 0x4a3   : > { %3291 = vmatpush3.bf16.msra.mxu1 %v3424_v60  ;;  %v2339_v60 = vsel %vm578_vm1, %v4175_v38, %v4385_v31 }
 0x4a4   : > { %v1917_v26 = vpop.permute.xlu0 %1916 }
 0x4a5   : > { %v1687_v42 = vpop.permute.xlu1 %1686 }
 0x4a6   : > { %v1730_v34 = vsel %vm578_vm1, %v4230_v37, %v1687_v42 }
 0x4a7   : > { %v1752_v14 = vsel %vm1746_vm11, %v1730_v34, %v1711_v59  ;;  %v2361_v34 = vsel %vm1746_vm11, %v2339_v60, %v4381_v19 }
 0x4a8   : > { %v3105_v32 = vcombine.low %v1752_v14, %v1754_v54  ;;  %v1697_v10 = vpop.permute.xlu0 %1696 }
 0x4a9   : > { %v2295_v17 = vpop.permute.xlu1 %2294  ;;  %v1745_v38 = vsel %vm578_vm1, %v4287_v3, %v1697_v10  ;;  %v2342_v3 = vsel %vm578_vm1, %v4205_v23, %v4402_v48 }
 0x4aa   : > { %3281 = vmatmul.mubr.msk.bf16.vlgmr.msra.gmra.mxu0 %vm1991_vm12, %v3105_v32  ;;  %v2336_v21 = vsel %vm578_vm1, %v4239_v16, %v2295_v17 }
 0x4ab   : > { %v2359_v16 = vsel %vm1746_vm11, %v2336_v21, %v4389_v55 }
 0x4ac   : > { %v1913_v2 = vpop.permute.xlu0 %1912 }
 0x4ad   : > { %v1891_v63 = vpop.permute.xlu1 %1890 }
 0x4b0   : > { %v2301_v15 = vpop.permute.xlu0 %2300 }
 0x4b1   : > { %v1887_v0 = vpop.permute.xlu1 %1886 }
 0x4b2   : > { %v1932_v58 = vsel %vm578_vm1, %v4279_v53, %v1887_v0 }
 0x4b3   : > { %v1951_v46 = vsel %vm1746_vm11, %v1932_v58, %v1911_v12 }
 0x4b4   : > { %v1693_v20 = vpop.permute.xlu0 %1692 }
 0x4b5   : > { %v1719_v25 = vpop.permute.xlu1 %1718  ;;  %v1739_v37 = vsel %vm578_vm1, %v4285_v1, %v1693_v20  ;;  %v1938_v1 = vsel %vm578_vm1, %v4247_v61, %v1891_v63 }
 0x4b6   : > { %v1758_v59 = vsel %vm1746_vm11, %v1739_v37, %v1717_v28  ;;  %v1955_v61 = vsel %vm1746_vm11, %v1938_v1, %v1915_v24  ;;  %v2345_v24 = vsel %vm578_vm1, %v4273_v44, %v2301_v15  ;;  %v2363_v44 = vsel %vm1746_vm11, %v2342_v3, %v4383_v47 }
 0x4b7   : > { %v3106_v30 = vcombine.low %v1756_v11, %v1758_v59 }
 0x4b8   : > { %v1893_v5 = vpop.permute.xlu0 %1892 }
 0x4b9   : > { %v2307_v13 = vpop.permute.xlu1 %2306  ;;  %3284 = vmatprep.mubr.msk.bf16.mxu0 %vm1991_vm12, %v3106_v30  ;;  %v1941_v6 = vsel %vm578_vm1, %v4301_v57, %v1893_v5 }
 0x4ba   : > { %v1957_v28 = vsel %vm1746_vm11, %v1941_v6, %v1917_v26  ;;  %v2354_v47 = vsel %vm578_vm1, %v4327_v62, %v2307_v13 }
 0x4bb   : > { %v3097_v31 = vcombine.low %v1955_v61, %v1957_v28 }
 0x4bc   : > { %v1889_v8 = vpop.permute.xlu0 %1888 }
 0x4bd   : > { %v2327_v29 = vpop.permute.xlu1 %2326  ;;  %v1935_v57 = vsel %vm578_vm1, %v4318_v33, %v1889_v8  ;;  %v3125_v33 = vcombine.low %v2359_v16, %v2361_v34 }
 0x4be   : > { %v1953_v53 = vsel %vm1746_vm11, %v1935_v57, %v1913_v2  ;;  %v3135_v57 = vld [vmem:[%s4682_s12] ss:$0 sm:$0xff] }
 0x4bf   : > { %v3096_v42 = vcombine.low %v1951_v46, %v1953_v53 }
 0x4c0   : > { %v1721_v26 = vpop.permute.xlu0 %1720 }
 0x4c1   : > { %v1695_v54 = vpop.permute.xlu1 %1694  ;;  %v1762_v14 = vsel %vm1746_vm11, %v1745_v38, %v1721_v26  ;;  %3272 = vmatprep.mubr.msk.bf16.mxu1 %vm1991_vm12, %v3096_v42 }
 0x4c2   : > { %v1742_v55 = vsel %vm578_vm1, %v4332_v27, %v1695_v54  ;;  %3273 = vmatmul.mubr.msk.bf16.gmra.mxu1 %vm1991_vm12, %v3097_v31  ;;  %v2365_v27 = vsel %vm1746_vm11, %v2345_v24, %v4410_v45 }
 0x4c3   : > { %v1760_v12 = vsel %vm1746_vm11, %v1742_v55, %v1719_v25  ;;  %3292 = vmatprep.mubr.msk.bf16.mxu1 %vm1991_vm12, %v3125_v33  ;;  %v3126_v17 = vcombine.low %v2363_v44, %v2365_v27 }
 0x4c4   : > { %v3107_v19 = vcombine.low %v1760_v12, %v1762_v14  ;;  %v2305_v32 = vpop.permute.xlu0 %2304 }
 0x4c5   : > { %v2303_v10 = vpop.permute.xlu1 %2302  ;;  %v2351_v23 = vsel %vm578_vm1, %v4356_v18, %v2305_v32 }
 0x4c6   : > { %3285 = vmatmul.mubr.msk.bf16.gmra.mxu0 %vm1991_vm12, %v3107_v19  ;;  %v2348_v63 = vsel %vm578_vm1, %v4354_v51, %v2303_v10 }
 0x4c7   : > { %v2367_v15 = vsel %vm1746_vm11, %v2348_v63, %v2327_v29 }
 0x4c8   : > { %v2309_v2 = vpop.permute.xlu0 %2308 }
 0x4c9   : > { %v2331_v0 = vpop.permute.xlu1 %2330  ;;  %v2357_v20 = vsel %vm578_vm1, %v4363_v7, %v2309_v2 }
 0x4ca   : > { %3293 = vmatmul.mubr.msk.bf16.vlgmr.msra.gmra.mxu1 %vm1991_vm12, %v3126_v17  ;;  %v2371_v51 = vsel %vm1746_vm11, %v2354_v47, %v2331_v0 }
 0x4cc   : > { %v2329_v48 = vpop.permute.xlu0 %2328 }
 0x4cd   : > { %v2369_v45 = vsel %vm1746_vm11, %v2351_v23, %v2329_v48 }
 0x4ce   : > { %v3127_v22 = vcombine.low %v2367_v15, %v2369_v45 }
 0x4d0   : > { %v2333_v25 = vpop.permute.xlu0 %2332  ;;  %3296 = vmatprep.mubr.msk.bf16.mxu1 %vm1991_vm12, %v3127_v22 }
 0x4d1   : > { %v2373_v18 = vsel %vm1746_vm11, %v2357_v20, %v2333_v25 }
 0x4d2   : > { %v3128_v37 = vcombine.low %v2371_v51, %v2373_v18 }
 0x4d4   : > { %3297 = vmatmul.mubr.msk.bf16.gmra.mxu1 %vm1991_vm12, %v3128_v37 }
 0x55e   : > { %v3270_v11 = vpop.f32.mrf.mxu1 }
 0x560   : > { %v2041_v59 = vpop.f32.mrf.mxu1 }
 0x562   : > { %v3271_v5 = vpop.f32.mrf.mxu1 }
 0x564   : > { %v2044_v21 = vpop.f32.mrf.mxu1 }
 0x56a   : > { %v3282_v30 = vpop.f32.mrf.mxu0 }
 0x56b   : > { %v2159_v29 = vadd.f32 %v3282_v30, %v3270_v11 }
 0x56c   : > { %v2150_v6 = vpop.f32.mrf.mxu0 }
 0x56d   : > { %v2151_v16 = vadd.f32 %v2150_v6, %v2041_v59 }
 0x56e   : > { %v3283_v13 = vpop.f32.mrf.mxu0 }
 0x56f   : > { %v2162_v61 = vadd.f32 %v3283_v13, %v3271_v5 }
 0x570   : > { %v2153_v1 = vpop.f32.mrf.mxu0 }
 0x571   : > { %v2154_v26 = vadd.f32 %v2153_v1, %v2044_v21 }
 0x582   : > { %v3274_v62 = vpop.f32.mrf.mxu1 }
 0x584   : > { %v2057_v58 = vpop.f32.mrf.mxu1 }
 0x586   : > { %v3275_v7 = vpop.f32.mrf.mxu1  ;;  %v3286_v60 = vpop.f32.mrf.mxu0 }
 0x587   : > { %v2175_v27 = vadd.f32 %v3286_v60, %v3274_v62 }
 0x588   : > { %v2060_v8 = vpop.f32.mrf.mxu1  ;;  %v2166_v42 = vpop.f32.mrf.mxu0 }
 0x589   : > { %v2167_v2 = vadd.f32 %v2166_v42, %v2057_v58 }
 0x58a   : > { %v3294_v28 = vpop.f32.mrf.mxu1  ;;  %v3287_v24 = vpop.f32.mrf.mxu0 }
 0x58b   : > { %v2489_v46 = vadd.f32 %v3294_v28, %v2159_v29  ;;  %v2178_v0 = vadd.f32 %v3287_v24, %v3275_v7 }
 0x58c   : > { %v2456_v53 = vpop.f32.mrf.mxu1  ;;  %v2169_v23 = vpop.f32.mrf.mxu0 }
 0x58d   : > { %v4491_v34 = vadd.f32 %v3135_v57, %v2489_v46  ;;  %v2487_v38 = vadd.f32 %v2456_v53, %v2151_v16  ;;  %v2170_v51 = vadd.f32 %v2169_v23, %v2060_v8 }
 0x58e   : > { %v3295_v31 = vpop.f32.mrf.mxu1 }
 0x58f   : > { %v2512_v54 = vsub.f32 0.0, %v4491_v34  ;;  %v4494_v33 = vadd.f32 %v3135_v57, %v2487_v38  ;;  %v2490_v14 = vadd.f32 %v3295_v31, %v2162_v61 }
 0x590   : > { %v2459_v55 = vpop.f32.mrf.mxu1 }
 0x591   : > { %v2522_v12 = vmul.f32 1.442695, %v2512_v54  ;;  %v2510_v19 = vsub.f32 0.0, %v4494_v33  ;;  %v4497_v3 = vadd.f32 %v3135_v57, %v2490_v14  ;;  %v2488_v32 = vadd.f32 %v2459_v55, %v2154_v26 }
 0x593   : > { %3522 = vpow2.f32 %v2522_v12  ;;  %v2518_v44 = vmul.f32 1.442695, %v2510_v19  ;;  %v2513_v10 = vsub.f32 0.0, %v4497_v3  ;;  %v4500_v17 = vadd.f32 %v3135_v57, %v2488_v32 }
 0x594   : > { %v3298_v63 = vpop.f32.mrf.mxu1 }
 0x595   : > { %3524 = vpow2.f32 %v2518_v44  ;;  %v2524_v48 = vmul.f32 1.442695, %v2513_v10  ;;  %v2511_v15 = vsub.f32 0.0, %v4500_v17  ;;  %v2493_v45 = vadd.f32 %v3298_v63, %v2175_v27 }
 0x596   : > { %v2472_v22 = vpop.f32.mrf.mxu1 }
 0x597   : > { %3526 = vpow2.f32 %v2524_v48  ;;  %v2520_v47 = vmul.f32 1.442695, %v2511_v15  ;;  %v4503_v20 = vadd.f32 %v3135_v57, %v2493_v45  ;;  %v2491_v25 = vadd.f32 %v2472_v22, %v2167_v2 }
 0x598   : > { %v3299_v18 = vpop.f32.mrf.mxu1 }
 0x599   : > { %3528 = vpow2.f32 %v2520_v47  ;;  %v2516_v37 = vsub.f32 0.0, %v4503_v20  ;;  %v2506_v11 = vadd.f32 %v3135_v57, %v2491_v25  ;;  %v2494_v59 = vadd.f32 %v3299_v18, %v2178_v0 }
 0x59a   : > { %v2475_v30 = vpop.f32.mrf.mxu1 }
 0x59b   : > { %v2530_v5 = vmul.f32 1.442695, %v2516_v37  ;;  %v2514_v6 = vsub.f32 0.0, %v2506_v11  ;;  %v2509_v21 = vadd.f32 %v3135_v57, %v2494_v59  ;;  %v2492_v62 = vadd.f32 %v2475_v30, %v2170_v51 }
 0x59d   : > { %3530 = vpow2.f32 %v2530_v5  ;;  %v2526_v13 = vmul.f32 1.442695, %v2514_v6  ;;  %v2517_v58 = vsub.f32 0.0, %v2509_v21  ;;  %v2507_v7 = vadd.f32 %v3135_v57, %v2492_v62 }
 0x59f   : > { %3532 = vpow2.f32 %v2526_v13  ;;  %v2532_v1 = vmul.f32 1.442695, %v2517_v58  ;;  %v2515_v29 = vsub.f32 0.0, %v2507_v7 }
 0x5a0   : > { %v3523_v60 = vpop.eup %3522 }
 0x5a1   : > { %v2528_v8 = vmul.f32 1.442695, %v2515_v29  ;;  %3534 = vpow2.f32 %v2532_v1  ;;  %v2536_v16 = vadd.f32 1.0, %v3523_v60 }
 0x5a2   : > { %v3525_v28 = vpop.eup %3524 }
 0x5a3   : > { %v2534_v46 = vadd.f32 1.0, %v3525_v28  ;;  %3536 = vpow2.f32 %v2528_v8 }
 0x5a4   : > { %v3527_v53 = vpop.eup %3526 }
 0x5a5   : > { %3538 = vrcp.f32 %v2534_v46  ;;  %v2537_v42 = vadd.f32 1.0, %v3527_v53 }
 0x5a6   : > { %v3529_v61 = vpop.eup %3528  ;;  %3540 = vrcp.f32 %v2536_v16 }
 0x5a7   : > { %v2535_v38 = vadd.f32 1.0, %v3529_v61 }
 0x5a9   : > { %3542 = vrcp.f32 %v2535_v38 }
 0x5aa   : > { %v3531_v31 = vpop.eup %3530  ;;  %3544 = vrcp.f32 %v2537_v42 }
 0x5ab   : > { %v2540_v26 = vadd.f32 1.0, %v3531_v31 }
 0x5ac   : > { %v3533_v57 = vpop.eup %3532 }
 0x5ad   : > { %v2538_v54 = vadd.f32 1.0, %v3533_v57 }
 0x5ae   : > { %v3535_v14 = vpop.eup %3534 }
 0x5af   : > { %3546 = vrcp.f32 %v2538_v54  ;;  %v2541_v12 = vadd.f32 1.0, %v3535_v14 }
 0x5b0   : > { %v3537_v55 = vpop.eup %3536  ;;  %3548 = vrcp.f32 %v2540_v26 }
 0x5b1   : > { %v2539_v19 = vadd.f32 1.0, %v3537_v55 }
 0x5b2   : > { %v3539_v24 = vpop.eup %3538 }
 0x5b3   : > { %v2550_v32 = vmul.f32 %v3539_v24, %v4494_v33  ;;  %v3541_v27 = vpop.eup %3540  ;;  %3550 = vrcp.f32 %v2539_v19 }
 0x5b4   : > { %3552 = vrcp.f32 %v2541_v12  ;;  %v2552_v10 = vmul.f32 %v3541_v27, %v4491_v34 }
 0x5b5   : > { %2566 = vrot.lane.b32.xlu1 %v2550_v32, %s3681_s22 }
 0x5b6   : > { %v3543_v44 = vpop.eup %3542 }
 0x5b7   : > { %v2551_v2 = vmul.f32 %v3543_v44, %v4500_v17  ;;  %v3545_v63 = vpop.eup %3544 }
 0x5b8   : > { %v2553_v23 = vmul.f32 %v3545_v63, %v4497_v3  ;;  %v2602_v3 = vld [vmem:[%s4675_s5] sm:$0xf] }
 0x5b9   : > { %2570 = vrot.lane.b32.xlu1 %v2552_v10, %s3681_s22  ;;  %2568 = vrot.lane.b32.xlu0 %v2551_v2, %s3681_s22  ;;  %v2635_v47 = vsel %vm1066_vm3, %v2602_v3, 0 }
 0x5ba   : > { %3328 = vmatprep.subr.msk.bf16.mxu0 %vm1066_vm3, %v2602_v3 }
 0x5bb   : > { %3301 = vmatpush3.bf16.msra.mxu0 %v2635_v47 }
 0x5bc   : > { %v3547_v48 = vpop.eup %3546 }
 0x5bd   : > { %2572 = vrot.lane.b32.xlu0 %v2553_v23, %s3681_s22  ;;  %v2554_v33 = vmul.f32 %v3547_v48, %v2506_v11  ;;  %v3549_v15 = vpop.eup %3548 }
 0x5be   : > { %v2556_v0 = vmul.f32 %v3549_v15, %v4503_v20 }
 0x5bf   : > { %2574 = vrot.lane.b32.xlu1 %v2554_v33, %s3681_s22 }
 0x5c0   : > { %v3551_v45 = vpop.eup %3550 }
 0x5c1   : > { %v2555_v34 = vmul.f32 %v3551_v45, %v2507_v7  ;;  %v3553_v22 = vpop.eup %3552 }
 0x5c2   : > { %v2557_v17 = vmul.f32 %v3553_v22, %v2509_v21 }
 0x5c3   : > { %2578 = vrot.lane.b32.xlu1 %v2556_v0, %s3681_s22  ;;  %2576 = vrot.lane.b32.xlu0 %v2555_v34, %s3681_s22 }
 0x5c7   : > { %2580 = vrot.lane.b32.xlu0 %v2557_v17, %s3681_s22 }
 0x627   : > { %v2567_v25 = vpop.permute.xlu1 %2566 }
 0x628   : > { %v2590_v51 = vadd.f32 %v2567_v25, %v4010_v39 }
 0x62b   : > { %v2569_v20 = vpop.permute.xlu0 %2568  ;;  %v2571_v37 = vpop.permute.xlu1 %2570 }
 0x62c   : > { %v2591_v18 = vadd.f32 %v2569_v20, %v4012_v40  ;;  %v2592_v30 = vadd.f32 %v2571_v37, %v4005_v35 }
 0x62e   : > { %v2598_v11 = vpack.c.bf16 %v2591_v18, %v2590_v51 }
 0x62f   : > { %v2573_v59 = vpop.permute.xlu0 %2572 }
 0x630   : > { %v2593_v5 = vadd.f32 %v2573_v59, %v4007_v36  ;;  %2614 = vrot.lane.b32.xlu1 %v2598_v11, %s3680_s17 }
 0x631   : > { %v2575_v21 = vpop.permute.xlu1 %2574 }
 0x632   : > { %v2599_v6 = vpack.c.bf16 %v2593_v5, %v2592_v30  ;;  %v2594_v13 = vadd.f32 %v2575_v21, %v4048_v52 }
 0x634   : > { %2616 = vrot.lane.b32.xlu0 %v2599_v6, %s3680_s17 }
 0x635   : > { %v2577_v62 = vpop.permute.xlu0 %2576  ;;  %v2579_v58 = vpop.permute.xlu1 %2578 }
 0x636   : > { %v2595_v39 = vadd.f32 %v2577_v62, %v4051_v9  ;;  %v2596_v1 = vadd.f32 %v2579_v58, %v4042_v49  ;;  %v3425_v9 = vld [vmem:[%s4677_s7] sm:$0xff]  }
 0x637   : > { %3310 = vmatprep.subr.bf16.mxu1 %v3425_v9 }
 0x638   : > { %v2600_v40 = vpack.c.bf16 %v2595_v39, %v2594_v13  ;;  %3311 = vmatpush3.bf16.msra.mxu1 %v3425_v9 }
 0x639   : > { %v2581_v7 = vpop.permute.xlu0 %2580 }
 0x63a   : > { %v2597_v35 = vadd.f32 %v2581_v7, %v4045_v50  ;;  %2618 = vrot.lane.b32.xlu1 %v2600_v40, %s3680_s17 }
 0x63c   : > { %v2601_v36 = vpack.c.bf16 %v2597_v35, %v2596_v1 }
 0x63e   : > { %2754 = vrot.lane.b32.xlu1 %v4024_v43, %s3681_s22  ;;  %2620 = vrot.lane.b32.xlu0 %v2601_v36, %s3680_s17  ;;  %s3160_s17 = sshll.u32 %s3778_s29, 9  ;;  %s4630_s29 = scalar_lea.sflag [#allocation4], %s431_s16 }
 0x63f   : > { %s4622_s30 = scalar_lea.hbm %s4683_s13, %s3160_s17  ;;  %s3622_s17 = sshll.u32 %s3684_s20, 4  ;;  %s3623_s17 = int_to_ptr.vmem [resolvable:$false] %s3622_s17 }
 0x640   : > { %s3624_s24 = scalar_lea.vmem %s3623_s17, 1024  ;;  %p3625_p0 = scmp.lt.s32.totalorder %s4624_s23, %s3623_s17 }
 0x641   : > { %p3626_p1 = scmp.lt.s32.totalorder %s3624_s24, %s3618_s15 }
 0x642   : > { %2758 = vrot.lane.b32.xlu1 %v4061_v56, %s3681_s22  ;;  %2756 = vrot.lane.b32.xlu0 %v4016_v41, %s3681_s22  ;;  %v3136_v41 = vld [vmem:[%s4676_s6] ss:$0 sm:$0xff] }
 0x643   : > { %p3627_p2 = por %p3626_p1, %p3625_p0 }
 0x645   : > { %p3628_p3 = pnand %p3627_p2, %p3621_p13 }
 0x646   : > { %2760 = vrot.lane.b32.xlu0 %v4055_v4, %s3681_s22 }
 0x6a2   : > { %v2615_v49 = vpop.permute.xlu1 %2614 }
 0x6a3   : > { %3302 = vmatprep.mubr.msk.bf16.mxu0 %vm578_vm1, %v2615_v49 }
 0x6a6   : > { %v2617_v50 = vpop.permute.xlu0 %2616 }
 0x6a7   : > { %3303 = vmatmul.mubr.msk.bf16.vlgmr.msra.gmra.mxu0 %vm578_vm1, %v2617_v50 }
 0x6ac   : > { %v2619_v52 = vpop.permute.xlu1 %2618 }
 0x6ad   : > { %3306 = vmatprep.mubr.msk.bf16.mxu0 %vm578_vm1, %v2619_v52 }
 0x6b0   : > { %v2621_v43 = vpop.permute.xlu0 %2620  ;;  %v2755_v49 = vpop.permute.xlu1 %2754 }
 0x6b1   : > { %3307 = vmatmul.mubr.msk.bf16.gmra.mxu0 %vm578_vm1, %v2621_v43 }
 0x6b4   : > { %v2757_v50 = vpop.permute.xlu0 %2756 }
 0x767   : > { %v3304_v4 = vpop.f32.mrf.mxu0 }
 0x768   : > { %v4554_v56 = vadd.f32 %v3304_v4, %v3136_v41 }
 0x769   : > { %v2671_v29 = vpop.f32.mrf.mxu0 }
 0x76a   : > { %v2704_v60 = vsub.f32 0.0, %v4554_v56  ;;  %v4557_v8 = vadd.f32 %v3136_v41, %v2671_v29 }
 0x76b   : > { %v3305_v28 = vpop.f32.mrf.mxu0 }
 0x76c   : > { %v2714_v16 = vmul.f32 1.442695, %v2704_v60  ;;  %v2702_v46 = vsub.f32 0.0, %v4557_v8  ;;  %v2683_v53 = vadd.f32 %v3305_v28, %v3136_v41 }
 0x76d   : > { %v2674_v61 = vpop.f32.mrf.mxu0 }
 0x76e   : > { %3554 = vpow2.f32 %v2714_v16  ;;  %v2710_v42 = vmul.f32 1.442695, %v2702_v46  ;;  %v2705_v38 = vsub.f32 0.0, %v2683_v53  ;;  %v2675_v31 = vadd.f32 %v3136_v41, %v2674_v61  ;;  %v2761_v61 = vpop.permute.xlu0 %2760 }
 0x770   : > { %3556 = vpow2.f32 %v2710_v42  ;;  %v2716_v57 = vmul.f32 1.442695, %v2705_v38  ;;  %v2703_v26 = vsub.f32 0.0, %v2675_v31 }
 0x771   : > { %v3308_v14 = vpop.f32.mrf.mxu0 }
 0x772   : > { %3558 = vpow2.f32 %v2716_v57  ;;  %v2712_v54 = vmul.f32 1.442695, %v2703_v26  ;;  %v4560_v55 = vadd.f32 %v3308_v14, %v3136_v41 }
 0x773   : > { %v2687_v24 = vpop.f32.mrf.mxu0 }
 0x774   : > { %3560 = vpow2.f32 %v2712_v54  ;;  %v2708_v12 = vsub.f32 0.0, %v4560_v55  ;;  %v2688_v19 = vadd.f32 %v3136_v41, %v2687_v24 }
 0x775   : > { %v3309_v32 = vpop.f32.mrf.mxu0 }
 0x776   : > { %v2722_v27 = vmul.f32 1.442695, %v2708_v12  ;;  %v2706_v44 = vsub.f32 0.0, %v2688_v19  ;;  %v2699_v10 = vadd.f32 %v3309_v32, %v3136_v41 }
 0x777   : > { %v2690_v2 = vpop.f32.mrf.mxu0 }
 0x778   : > { %3562 = vpow2.f32 %v2722_v27  ;;  %v2718_v63 = vmul.f32 1.442695, %v2706_v44  ;;  %v2709_v23 = vsub.f32 0.0, %v2699_v10  ;;  %v2691_v48 = vadd.f32 %v3136_v41, %v2690_v2 }
 0x77a   : > { %3564 = vpow2.f32 %v2718_v63  ;;  %v2724_v15 = vmul.f32 1.442695, %v2709_v23  ;;  %v2707_v45 = vsub.f32 0.0, %v2691_v48 }
 0x77b   : > { %v3555_v33 = vpop.eup %3554 }
 0x77c   : > { %v2728_v0 = vadd.f32 1.0, %v3555_v33  ;;  %3566 = vpow2.f32 %v2724_v15  ;;  %v2720_v22 = vmul.f32 1.442695, %v2707_v45 }
 0x77d   : > { %v3557_v34 = vpop.eup %3556 }
 0x77e   : > { %v2726_v17 = vadd.f32 1.0, %v3557_v34  ;;  %3568 = vpow2.f32 %v2720_v22 }
 0x77f   : > { %v3559_v3 = vpop.eup %3558  ;;  %3570 = vrcp.f32 %v2728_v0 }
 0x780   : > { %v2729_v47 = vadd.f32 1.0, %v3559_v3  ;;  %3572 = vrcp.f32 %v2726_v17 }
 0x781   : > { %v3561_v25 = vpop.eup %3560 }
 0x782   : > { %3574 = vrcp.f32 %v2729_v47  ;;  %v2727_v20 = vadd.f32 1.0, %v3561_v25 }
 0x784   : > { %3576 = vrcp.f32 %v2727_v20 }
 0x785   : > { %v3563_v51 = vpop.eup %3562 }
 0x786   : > { %v2732_v18 = vadd.f32 1.0, %v3563_v51 }
 0x787   : > { %v3565_v37 = vpop.eup %3564 }
 0x788   : > { %v2730_v11 = vadd.f32 1.0, %v3565_v37  ;;  %3578 = vrcp.f32 %v2732_v18 }
 0x789   : > { %v3567_v59 = vpop.eup %3566 }
 0x78a   : > { %v2733_v30 = vadd.f32 1.0, %v3567_v59  ;;  %3580 = vrcp.f32 %v2730_v11 }
 0x78b   : > { %v3569_v5 = vpop.eup %3568 }
 0x78c   : > { %v3571_v6 = vpop.eup %3570  ;;  %3582 = vrcp.f32 %v2733_v30  ;;  %v2731_v21 = vadd.f32 1.0, %v3569_v5 }
 0x78d   : > { %v3573_v62 = vpop.eup %3572  ;;  %v2744_v40 = vmul.f32 %v3571_v6, %v4554_v56 }
 0x78e   : > { %3584 = vrcp.f32 %v2731_v21  ;;  %v2742_v7 = vmul.f32 %v3573_v62, %v4557_v8 }
 0x78f   : > { %v3575_v13 = vpop.eup %3574 }
 0x790   : > { %v2745_v39 = vmul.f32 %v3575_v13, %v2683_v53  ;;  %v2759_v53 = vpop.permute.xlu1 %2758 }
 0x791   : > { %v3577_v58 = vpop.eup %3576 }
 0x792   : > { %v2743_v1 = vmul.f32 %v3577_v58, %v2675_v31  ;;  %v2751_v35 = vpack.c.bf16 %v2745_v39, %v2744_v40  ;;  %v3141_v31 = vld [vmem:[%s4678_s8] ss:$0 sm:$0xff] }
 0x794   : > { %v2750_v36 = vpack.c.bf16 %v2743_v1, %v2742_v7  ;;  %v2767_v43 = vsel %vm578_vm1, %v2751_v35, %v2757_v50 }
 0x795   : > { %v3579_v9 = vpop.eup %3578 }
 0x796   : > { %v2764_v52 = vsel %vm578_vm1, %v2750_v36, %v2755_v49  ;;  %v2748_v60 = vmul.f32 %v3579_v9, %v4560_v55 }
 0x797   : > { %3312 = vmatprep.mubr.msk.bf16.mxu1 %vm1746_vm11, %v2764_v52  ;;  %v3581_v41 = vpop.eup %3580 }
 0x798   : > { %3313 = vmatmul.mubr.msk.bf16.vlgmr.msra.gmra.mxu1 %vm1746_vm11, %v2767_v43  ;;  %v2746_v8 = vmul.f32 %v3581_v41, %v2688_v19 }
 0x799   : > { %v3583_v4 = vpop.eup %3582 }
 0x79a   : > { %v2749_v29 = vmul.f32 %v3583_v4, %v2699_v10 }
 0x79b   : > { %v3585_v56 = vpop.eup %3584 }
 0x79c   : > { %v2747_v28 = vmul.f32 %v3585_v56, %v2691_v48  ;;  %v2753_v16 = vpack.c.bf16 %v2749_v29, %v2748_v60 }
 0x79e   : > { %v2752_v46 = vpack.c.bf16 %v2747_v28, %v2746_v8  ;;  %v2773_v38 = vsel %vm578_vm1, %v2753_v16, %v2761_v61 }
 0x7a0   : > { %v2770_v42 = vsel %vm578_vm1, %v2752_v46, %v2759_v53 }
 0x7a1   : > { %3316 = vmatprep.mubr.msk.bf16.mxu1 %vm1746_vm11, %v2770_v42 }
 0x7a2   : > { %3317 = vmatmul.mubr.msk.bf16.gmra.mxu1 %vm1746_vm11, %v2773_v38 }
 0x858   : > { %v3314_v57 = vpop.f32.mrf.mxu1 }
 0x859   : > { %v4577_v26 = vadd.f32 %v3314_v57, %v3141_v31 }
 0x85a   : > { %v2831_v54 = vpop.f32.mrf.mxu1 }
 0x85b   : > { %v2864_v14 = vsub.f32 0.0, %v4577_v26  ;;  %v4580_v55 = vadd.f32 %v3141_v31, %v2831_v54 }
 0x85c   : > { %v3315_v24 = vpop.f32.mrf.mxu1 }
 0x85d   : > { %v2874_v12 = vmul.f32 1.442695, %v2864_v14  ;;  %v2862_v19 = vsub.f32 0.0, %v4580_v55  ;;  %v4583_v32 = vadd.f32 %v3315_v24, %v3141_v31 }
 0x85e   : > { %v2834_v27 = vpop.f32.mrf.mxu1 }
 0x85f   : > { %3586 = vpow2.f32 %v2874_v12  ;;  %v2870_v44 = vmul.f32 1.442695, %v2862_v19  ;;  %v2865_v10 = vsub.f32 0.0, %v4583_v32  ;;  %v4586_v2 = vadd.f32 %v3141_v31, %v2834_v27 }
 0x861   : > { %3588 = vpow2.f32 %v2870_v44  ;;  %v2876_v63 = vmul.f32 1.442695, %v2865_v10  ;;  %v2863_v23 = vsub.f32 0.0, %v4586_v2 }
 0x862   : > { %v3318_v33 = vpop.f32.mrf.mxu1 }
 0x863   : > { %3590 = vpow2.f32 %v2876_v63  ;;  %v2872_v48 = vmul.f32 1.442695, %v2863_v23  ;;  %v4589_v15 = vadd.f32 %v3318_v33, %v3141_v31 }
 0x864   : > { %v2847_v45 = vpop.f32.mrf.mxu1 }
 0x865   : > { %3592 = vpow2.f32 %v2872_v48  ;;  %v2868_v0 = vsub.f32 0.0, %v4589_v15  ;;  %v4592_v34 = vadd.f32 %v3141_v31, %v2847_v45 }
 0x866   : > { %v3319_v22 = vpop.f32.mrf.mxu1 }
 0x867   : > { %v2882_v17 = vmul.f32 1.442695, %v2868_v0  ;;  %v2866_v3 = vsub.f32 0.0, %v4592_v34  ;;  %v4595_v47 = vadd.f32 %v3319_v22, %v3141_v31 }
 0x868   : > { %v2850_v25 = vpop.f32.mrf.mxu1 }
 0x869   : > { %3594 = vpow2.f32 %v2882_v17  ;;  %v2878_v20 = vmul.f32 1.442695, %v2866_v3  ;;  %v2869_v51 = vsub.f32 0.0, %v4595_v47  ;;  %v4598_v18 = vadd.f32 %v3141_v31, %v2850_v25 }
 0x86b   : > { %3596 = vpow2.f32 %v2878_v20  ;;  %v2884_v11 = vmul.f32 1.442695, %v2869_v51  ;;  %v2867_v59 = vsub.f32 0.0, %v4598_v18 }
 0x86c   : > { %v3587_v37 = vpop.eup %3586 }
 0x86d   : > { %v2888_v30 = vadd.f32 1.0, %v3587_v37  ;;  %3598 = vpow2.f32 %v2884_v11  ;;  %v2880_v6 = vmul.f32 1.442695, %v2867_v59 }
 0x86e   : > { %v3589_v5 = vpop.eup %3588 }
 0x86f   : > { %3600 = vrcp.f32 %v2888_v30  ;;  %v2886_v21 = vadd.f32 1.0, %v3589_v5 }
 0x870   : > { %v3591_v62 = vpop.eup %3590  ;;  %3602 = vpow2.f32 %v2880_v6 }
 0x871   : > { %3604 = vrcp.f32 %v2886_v21  ;;  %v2889_v13 = vadd.f32 1.0, %v3591_v62 }
 0x872   : > { %v3593_v39 = vpop.eup %3592 }
 0x873   : > { %3606 = vrcp.f32 %v2889_v13  ;;  %v2887_v58 = vadd.f32 1.0, %v3593_v39 }
 0x875   : > { %3608 = vrcp.f32 %v2887_v58 }
 0x876   : > { %v3595_v40 = vpop.eup %3594 }
 0x877   : > { %v2892_v7 = vadd.f32 1.0, %v3595_v40 }
 0x878   : > { %v3597_v1 = vpop.eup %3596 }
 0x879   : > { %3610 = vrcp.f32 %v2892_v7  ;;  %v2890_v35 = vadd.f32 1.0, %v3597_v1 }
 0x87a   : > { %v3599_v36 = vpop.eup %3598 }
 0x87b   : > { %3612 = vrcp.f32 %v2890_v35  ;;  %v2893_v50 = vadd.f32 1.0, %v3599_v36 }
 0x87c   : > { %v3601_v49 = vpop.eup %3600 }
 0x87d   : > { %v3603_v52 = vpop.eup %3602  ;;  %v2904_v43 = vmul.f32 %v3601_v49, %v4577_v26  ;;  %3614 = vrcp.f32 %v2893_v50 }
 0x87e   : > { %v3605_v9 = vpop.eup %3604  ;;  %v2891_v41 = vadd.f32 1.0, %v3603_v52 }
 0x87f   : > { %v2912_v4 = vpack.c.bf16 %v2904_v43, %v2904_v43  ;;  %v2902_v29 = vmul.f32 %v3605_v9, %v4580_v55 }
 0x880   : > { %v3607_v56 = vpop.eup %3606  ;;  %3616 = vrcp.f32 %v2891_v41 }
 0x881   : > { %2920 = vst.msk [vmem:[%s433_s21 + $0x8] sm:$0xf] %vm1187_vm4, %v2912_v4  ;;  %v2910_v60 = vpack.c.bf16 %v2902_v29, %v2902_v29  ;;  %v2905_v8 = vmul.f32 %v3607_v56, %v4583_v32 }
 0x882   : > { %v3609_v28 = vpop.eup %3608 }
 0x883   : > { %2918 = vst.msk [vmem:[%s433_s21] sm:$0xf] %vm1187_vm4, %v2910_v60  ;;  %v2913_v16 = vpack.c.bf16 %v2905_v8, %v2905_v8  ;;  %v2903_v46 = vmul.f32 %v3609_v28, %v4586_v2 }
 0x885   : > { %2921 = vst.msk [vmem:[%s433_s21 + $0xc] sm:$0xf] %vm1187_vm4, %v2913_v16  ;;  %v2911_v53 = vpack.c.bf16 %v2903_v46, %v2903_v46 }
 0x886   : > { %v3611_v61 = vpop.eup %3610 }
 0x887   : > { %2919 = vst.msk [vmem:[%s433_s21 + $0x4] sm:$0xf] %vm1187_vm4, %v2911_v53  ;;  %v2908_v42 = vmul.f32 %v3611_v61, %v4589_v15 }
 0x888   : > { %v3613_v38 = vpop.eup %3612 }
 0x889   : > { %v2916_v31 = vpack.c.bf16 %v2908_v42, %v2908_v42  ;;  %v2906_v57 = vmul.f32 %v3613_v38, %v4592_v34 }
 0x88a   : > { %v3615_v26 = vpop.eup %3614 }
 0x88b   : > { %2924 = vst.msk [vmem:[%s433_s21 + $0x18] sm:$0xf] %vm1187_vm4, %v2916_v31  ;;  %v2914_v54 = vpack.c.bf16 %v2906_v57, %v2906_v57  ;;  %v2909_v14 = vmul.f32 %v3615_v26, %v4595_v47 }
 0x88d   : > { %v3617_v55 = vpop.eup %3616  ;;  %2922 = vst.msk [vmem:[%s433_s21 + $0x10] sm:$0xf] %vm1187_vm4, %v2914_v54  ;;  %v2917_v24 = vpack.c.bf16 %v2909_v14, %v2909_v14 }
 0x88e   : > { %v2907_v12 = vmul.f32 %v3617_v55, %v4598_v18 }
 0x88f   : > { %2925 = vst.msk [vmem:[%s433_s21 + $0x1c] sm:$0xf] %vm1187_vm4, %v2917_v24 }
 0x890   : > { %v2915_v19 = vpack.c.bf16 %v2907_v12, %v2907_v12 }
 0x892   : > { %2923 = vst.msk [vmem:[%s433_s21 + $0x14] sm:$0xf] %vm1187_vm4, %v2915_v19 }
 0x893   : > { %3631 = shalt.err (!%p3628_p3)
}
 0x894   : > { %s3632_s16 = scalar_lea.hbm %s4622_s30, 512  ;;  %s3636_s20 = scalar_lea.hbm %s4683_s13, 1024 }
 0x895   : > { %p3633_p4 = scmp.ne.s32.totalorder %s4622_s30, %s3632_s16  ;;  %p3637_p9 = scmp.lt.s32.totalorder %s4622_s30, %s4683_s13 }
 0x896   : > { %p3638_p10 = scmp.lt.s32.totalorder %s3636_s20, %s3632_s16 }
 0x897   : > { %p3634_p7 = pnand %p3633_p4, %p3795_p5 }
 0x898   : > { %p3639_p11 = por %p3638_p10, %p3637_p9 }
 0x899   : > { %p3635_p8 = pneg %p3634_p7 }
 0x89b   : > { %p3640_p12 = pnand %p3639_p11, %p3635_p8 }
 0x89d   : > { %3643 = shalt.err (!%p3640_p12)
}
 0x89e   : > { %s3685_s15 = smov 64   ;;  %s3686_s17 = smov 4  }
 0x89f   : > { %3330 = dma.vmem_to_hbm [thread:$0]  (%p3795_p5), %s4624_s23, 512, %s4622_s30, %s4630_s29, %s3685_s15, %s3685_s15, %s3686_s17  }
 0x8a0 PF: > { %p3336_p13 = scmp.ge.s32.totalorder %s3678_s28, 2  ;;  %s2955_s24 = sand.u32 1, %s3666_s25  }
 0x8a1   : > { %s2956_s0 = scalar_lea.sflag [#allocation4], %s2955_s24 }
 0x8a2   : > { %p3333_p0 = pnand %p3336_p13, %p3799_p6 }
 0x8a4   : > { %p3334_p1 = pneg %p3333_p0 }
 0x8a6   : > { %3661 = dma.done.wait (%p3334_p1), %s2956_s0, 512  }
 0x8a7   : > { %3663 = vsyncadd (%p3334_p1), %s2956_s0, 4294966784  ;;  %s4697_s1 = sld [smem:[#allocation6_spill]]  ;;  %p23_p2 = scmp.ge.s32.totalorder %s3782_s14, 4  }
 0x8a8   : > { %s4698_s25 = smov %s3670_s26  ;;  %s4699_s26 = smov %s3674_s27 }
 0x8a9   : > { %s4701_s28 = smov %s3782_s14  ;;  %25 = sbr.rel (!%p23_p2) target bundleno = 6 (0x6), region = 114 }
 0x8ad   : > { %s4700_s27 = smov %s4697_s1 }
 0x8ae   :  { %2961 = vsyncpa [#allocation4], 1 }
 0x8af   :  { %2963 = vsyncpa [#allocation4 + $0x1], 1 }

</bundles_post_ra>
